<compile_context>
chip_gen: v7x
topology: tpu7x:2x2x1
jax: 0.10.0
libtpu: 0.0.40
codegen_flags: <defaults>
</compile_context>

<pallas_src>
import functools

import jax
import jax.numpy as jnp
from jax import lax
from jax.experimental import pallas as pl
from jax.experimental.pallas import tpu as pltpu


def _round_up(x, m):
    return ((x + m - 1) // m) * m


def lstm_head_kernel(xg_ref, whh_ref, w23_ref, b23_ref, out_ref):
    """LSTM recurrence + fused Linear(15)->Linear(n_out) head on the last hidden state.

    xg_ref : (T, Bc, 4Hp) f32   pre-projected gate inputs (W_ih @ x + b, i/f/o pre-scaled by 0.5)
    whh_ref: (Hp, 4Hp)    bf16  hidden->gates weights (gate order i,f,g,o; i/f/o pre-scaled by 0.5)
    w23_ref: (Hp, Op)     bf16  fused head weights
    b23_ref: (1, Op)      f32   fused head bias
    out_ref: (Bc, Op)     f32   lane-dense padded output
    """
    T = xg_ref.shape[0]
    Bc = xg_ref.shape[1]
    Hp = whh_ref.shape[0]

    whh = whh_ref[...]                          # loaded once, (Hp, 4Hp) bf16

    h0 = jnp.zeros((Bc, Hp), jnp.float32)
    c0 = jnp.zeros((Bc, Hp), jnp.float32)

    def step(t, carry):
        h, c = carry
        # (Bc, Hp) @ (Hp, 4Hp) recurrent matmul; input projection already folded into xg.
        gates = xg_ref[t] + jnp.dot(h.astype(whh.dtype), whh,
                                    preferred_element_type=jnp.float32)
        # Single contiguous EUP tanh over all four gates; sigmoid rebuilt on the VPU.
        tg = jnp.tanh(gates)                                  # (Bc, 4Hp)
        i_g = 0.5 * tg[:, 0 * Hp:1 * Hp] + 0.5                # sigmoid(x) = 0.5*tanh(x/2)+0.5
        f_g = 0.5 * tg[:, 1 * Hp:2 * Hp] + 0.5
        g_g = tg[:, 2 * Hp:3 * Hp]
        o_g = 0.5 * tg[:, 3 * Hp:4 * Hp] + 0.5
        c_new = f_g * c + i_g * g_g
        h_new = o_g * jnp.tanh(c_new)
        return h_new, c_new

    # T is static and small -> fully unroll so adjacent timesteps can co-issue on MXU/EUP/VPU.
    h_last, _ = lax.fori_loop(0, T, step, (h0, c0), unroll=True)

    # Fused heads: one (Bc, Hp) @ (Hp, Op) matmul, lane-dense store.
    out_ref[...] = (jnp.dot(h_last.astype(w23_ref.dtype), w23_ref[...],
                            preferred_element_type=jnp.float32) + b23_ref[...])


def pack_params(params):
    """One-time weight packing (call at parameter-load time, not per forward)."""
    H = params["w_hh"].shape[1]
    n_out = params["w3"].shape[0]
    Hp = _round_up(H, 128)                      # lane-aligned gate width
    Op = _round_up(n_out, 128)                  # lane-dense output width

    def pack_gates(w):
        """(4H, In) PyTorch layout -> (In, 4Hp), each gate block zero-padded H->Hp."""
        In = w.shape[1]
        w4 = w.reshape(4, H, In)
        w4 = jnp.pad(w4, ((0, 0), (0, Hp - H), (0, 0)))
        return jnp.transpose(w4.reshape(4 * Hp, In))          # (In, 4Hp) f32

    wih = pack_gates(params["w_ih"])                                      # (E, 4Hp)
    whh = jnp.pad(pack_gates(params["w_hh"]), ((0, Hp - H), (0, 0)))      # (Hp, 4Hp)
    b = jnp.pad((params["b_ih"] + params["b_hh"]).reshape(4, H),
                ((0, 0), (0, Hp - H))).reshape(1, 4 * Hp)                 # (1, 4Hp)

    # Pre-scale i/f/o gate columns by 0.5 (exact in fp) -> in-kernel sigmoid from one tanh.
    gate_scale = jnp.concatenate([
        jnp.full((Hp,), 0.5, jnp.float32), jnp.full((Hp,), 0.5, jnp.float32),
        jnp.ones((Hp,), jnp.float32), jnp.full((Hp,), 0.5, jnp.float32)])  # (4Hp,)

    # Input projection folded into the embedding table (f32): gather this instead of `embed`.
    embed_proj = (params["embed"] @ wih + b) * gate_scale                 # (V+1, 4Hp) f32
    whh_scaled = (whh * gate_scale).astype(jnp.bfloat16)                  # (Hp, 4Hp)  bf16

    # Fuse the two activation-free Linear layers in f32.
    w23 = params["w2"].T @ params["w3"].T                                 # (H, n_out) f32
    b23 = params["b2"] @ params["w3"].T + params["b3"]                    # (n_out,)   f32
    w23 = jnp.pad(w23, ((0, Hp - H), (0, Op - n_out))).astype(jnp.bfloat16)   # (Hp, Op)
    b23 = jnp.pad(b23, (0, Op - n_out)).reshape(1, Op).astype(jnp.float32)    # (1, Op)

    return {"embed_proj": embed_proj, "whh": whh_scaled, "w23": w23, "b23": b23}


def lstm_forward(tokens, packed, *, n_out):
    """tokens: (B, T) int32 indices; packed: output of pack_params. Returns (B, n_out) f32."""
    B, T = tokens.shape
    embed_proj = packed["embed_proj"]           # (V+1, 4Hp) f32
    whh = packed["whh"]                         # (Hp, 4Hp)  bf16
    w23 = packed["w23"]                         # (Hp, Op)   bf16
    b23 = packed["b23"]                         # (1, Op)    f32
    Hp, G = whh.shape                           # G = 4*Hp
    Op = w23.shape[1]

    # Batch chunking: sublane-align small batches; chunk big batches at 128 rows so the MXU M
    # dimension fills up and the grid axis can be split across TensorCores (megacore / v7x).
    if B <= 128:
        Bc = _round_up(max(B, 8), 8)
        Bp = Bc
    else:
        Bc = 128
        Bp = _round_up(B, Bc)
    n_chunks = Bp // Bc

    # Gather the pre-projected gate inputs, time-major: (T, Bp, 4Hp) f32.
    xg = embed_proj[tokens.T]                                   # (T, B, 4Hp)
    xg = jnp.pad(xg, ((0, 0), (0, Bp - B), (0, 0)))             # pad batch (rows compute 0s)

    flops = 2 * T * Bp * Hp * G + 2 * Bp * Hp * Op
    transcendentals = T * Bp * (G + Hp)                         # one 4Hp tanh + one Hp tanh / step
    bytes_accessed = int(xg.size * 4 + n_chunks * (whh.size * 2 + w23.size * 2 + b23.size * 4)
                         + Bp * Op * 4)

    block_bytes = (T * Bc * G * 4          # xg block (f32)
                   + Hp * G * 2            # whh (bf16)
                   + Hp * Op * 2           # w23 (bf16)
                   + Op * 4                # b23
                   + Bc * Op * 4)          # out block
    vmem_limit = int(min(100 * 2 ** 20, max(16 * 2 ** 20, 2 * block_bytes + (4 << 20))))

    out_pad = pl.pallas_call(
        lstm_head_kernel,
        out_shape=jax.ShapeDtypeStruct((Bp, Op), jnp.float32),
        grid=(n_chunks,),
        in_specs=[
            pl.BlockSpec((T, Bc, G), lambda i: (0, i, 0)),      # per-chunk gate inputs
            pl.BlockSpec((Hp, G), lambda i: (0, 0)),            # weights resident across chunks
            pl.BlockSpec((Hp, Op), lambda i: (0, 0)),
            pl.BlockSpec((1, Op), lambda i: (0, 0)),
        ],
        out_specs=pl.BlockSpec((Bc, Op), lambda i: (i, 0)),
        compiler_params=pltpu.CompilerParams(
            dimension_semantics=("parallel",),
            vmem_limit_bytes=vmem_limit),
        cost_estimate=pl.CostEstimate(flops=flops,
                                      transcendentals=transcendentals,
                                      bytes_accessed=bytes_accessed),
    )(xg, whh, w23, b23)

    return out_pad[:B, :n_out]


def lstm_forward_ref(tokens, params):
    """Pure-JAX f32 reference with identical semantics (for validation)."""
    emb = params["embed"][tokens]                        # (B, T, E)
    B, T, _ = emb.shape
    H = params["w_hh"].shape[1]
    wih_t = params["w_ih"].T
    whh_t = params["w_hh"].T
    b = params["b_ih"] + params["b_hh"]

    h = jnp.zeros((B, H), jnp.float32)
    c = jnp.zeros((B, H), jnp.float32)
    for t in range(T):
        gates = emb[:, t, :] @ wih_t + h @ whh_t + b
        i_g = jax.nn.sigmoid(gates[:, 0 * H:1 * H])
        f_g = jax.nn.sigmoid(gates[:, 1 * H:2 * H])
        g_g = jnp.tanh(gates[:, 2 * H:3 * H])
        o_g = jax.nn.sigmoid(gates[:, 3 * H:4 * H])
        c = f_g * c + i_g * g_g
        h = o_g * jnp.tanh(c)
    y2 = h @ params["w2"].T + params["b2"]
    y3 = y2 @ params["w3"].T + params["b3"]
    return y3


def init_params(key, vocab_size, embedding_dim, n_hidden, n_outputs):
    ks = jax.random.split(key, 9)
    scale = 0.1
    return {
        "embed": scale * jax.random.normal(ks[0], (vocab_size + 1, embedding_dim), jnp.float32),
        "w_ih": scale * jax.random.normal(ks[1], (4 * n_hidden, embedding_dim), jnp.float32),
        "w_hh": scale * jax.random.normal(ks[2], (4 * n_hidden, n_hidden), jnp.float32),
        "b_ih": scale * jax.random.normal(ks[3], (4 * n_hidden,), jnp.float32),
        "b_hh": scale * jax.random.normal(ks[4], (4 * n_hidden,), jnp.float32),
        "w2": scale * jax.random.normal(ks[5], (15, n_hidden), jnp.float32),
        "b2": scale * jax.random.normal(ks[6], (15,), jnp.float32),
        "w3": scale * jax.random.normal(ks[7], (n_outputs, 15), jnp.float32),
        "b3": scale * jax.random.normal(ks[8], (n_outputs,), jnp.float32),
    }


if __name__ == "__main__":
    # Small deterministic shapes consistent with the module's forward.
    vocab_size = 100
    embedding_dim = 16
    n_hidden = 50          # module default
    n_outputs = 4
    batch = 4
    seq_len = 10

    key = jax.random.PRNGKey(0)
    k_tok, k_par = jax.random.split(key)
    tokens = jax.random.randint(k_tok, (batch, seq_len), 0, vocab_size + 1, dtype=jnp.int32)
    params = init_params(k_par, vocab_size, embedding_dim, n_hidden, n_outputs)

    packed = pack_params(params)          # one-time packing, hoisted off the per-call path
    fwd = jax.jit(functools.partial(lstm_forward, n_out=n_outputs))

    out = fwd(tokens, packed)
    out = jax.block_until_ready(out)

    ref = lstm_forward_ref(tokens, params)
    assert out.shape == (batch, n_outputs)
    # bf16 MXU operands (recurrence + fused head) -> relaxed tolerance vs the f32 reference.
    assert jnp.allclose(out, ref, atol=2e-2, rtol=2e-2), "mismatch vs reference"

    print("KERNEL_OK")
</pallas_src>

<mosaic_0001>
module attributes {stable_mosaic.version = 11 : i64} {
  func.func @lstm_head_kernel(%arg0: i32, %arg1: memref<10x8x512xf32, #tpu.memory_space<vmem>>, %arg2: memref<128x512xbf16, #tpu.memory_space<vmem>>, %arg3: memref<128x128xbf16, #tpu.memory_space<vmem>>, %arg4: memref<1x128xf32, #tpu.memory_space<vmem>>, %arg5: memref<8x128xf32, #tpu.memory_space<vmem>>) attributes {dimension_semantics = [#tpu.dimension_semantics<parallel>], iteration_bounds = array<i64: 1>, scalar_prefetch = 0 : i64, scratch_operands = 0 : i64, tpu.core_type = #tpu.core_type<tc>, window_params = [{transform_indices = @transform_0, window_bounds = array<i64: 10, 8, 512>}, {pipeline_mode = #tpu.pipeline_mode<synchronous>, transform_indices = @transform_1, window_bounds = array<i64: 128, 512>}, {pipeline_mode = #tpu.pipeline_mode<synchronous>, transform_indices = @transform_2, window_bounds = array<i64: 128, 128>}, {pipeline_mode = #tpu.pipeline_mode<synchronous>, transform_indices = @transform_3, window_bounds = array<i64: 1, 128>}, {transform_indices = @transform_4, window_bounds = array<i64: 8, 128>}]} {
    %c0 = arith.constant 0 : index
    %c0_0 = arith.constant 0 : index
    %0 = vector.load %arg2[%c0, %c0_0] : memref<128x512xbf16, #tpu.memory_space<vmem>>, vector<128x512xbf16>
    %cst = arith.constant 0.000000e+00 : f32
    %1 = vector.broadcast %cst : f32 to vector<8x128xf32>
    %cst_1 = arith.constant 0.000000e+00 : f32
    %2 = vector.broadcast %cst_1 : f32 to vector<8x128xf32>
    %c0_i32 = arith.constant 0 : i32
    %3 = arith.index_cast %c0_i32 : i32 to index
    %c0_2 = arith.constant 0 : index
    %c0_3 = arith.constant 0 : index
    %4 = vector.load %arg1[%3, %c0_2, %c0_3] : memref<10x8x512xf32, #tpu.memory_space<vmem>>, vector<1x8x512xf32>
    %5 = vector.shape_cast %4 : vector<1x8x512xf32> to vector<8x512xf32>
    %6 = arith.truncf %1 : vector<8x128xf32> to vector<8x128xbf16>
    %cst_4 = arith.constant dense<0.000000e+00> : vector<8x512xf32>
    %7 = tpu.matmul %6, %0, %cst_4 {dimension_numbers = #tpu.dot_dimension_numbers<[1], [0], [0], [1], [0, 0, 1, 1], [], []>} : vector<8x128xbf16>, vector<128x512xbf16>, vector<8x512xf32> -> vector<8x512xf32>
    %8 = arith.addf %5, %7 : vector<8x512xf32>
    %9 = math.tanh %8 : vector<8x512xf32>
    %10 = vector.extract_strided_slice %9 {offsets = [0, 0], sizes = [8, 128], strides = [1, 1]} : vector<8x512xf32> to vector<8x128xf32>
    %cst_5 = arith.constant 5.000000e-01 : f32
    %11 = vector.broadcast %cst_5 : f32 to vector<8x128xf32>
    %12 = arith.mulf %11, %10 : vector<8x128xf32>
    %cst_6 = arith.constant 5.000000e-01 : f32
    %13 = vector.broadcast %cst_6 : f32 to vector<8x128xf32>
    %14 = arith.addf %12, %13 : vector<8x128xf32>
    %15 = vector.extract_strided_slice %9 {offsets = [0, 128], sizes = [8, 128], strides = [1, 1]} : vector<8x512xf32> to vector<8x128xf32>
    %cst_7 = arith.constant 5.000000e-01 : f32
    %16 = vector.broadcast %cst_7 : f32 to vector<8x128xf32>
    %17 = arith.mulf %16, %15 : vector<8x128xf32>
    %cst_8 = arith.constant 5.000000e-01 : f32
    %18 = vector.broadcast %cst_8 : f32 to vector<8x128xf32>
    %19 = arith.addf %17, %18 : vector<8x128xf32>
    %20 = vector.extract_strided_slice %9 {offsets = [0, 256], sizes = [8, 128], strides = [1, 1]} : vector<8x512xf32> to vector<8x128xf32>
    %21 = vector.extract_strided_slice %9 {offsets = [0, 384], sizes = [8, 128], strides = [1, 1]} : vector<8x512xf32> to vector<8x128xf32>
    %cst_9 = arith.constant 5.000000e-01 : f32
    %22 = vector.broadcast %cst_9 : f32 to vector<8x128xf32>
    %23 = arith.mulf %22, %21 : vector<8x128xf32>
    %cst_10 = arith.constant 5.000000e-01 : f32
    %24 = vector.broadcast %cst_10 : f32 to vector<8x128xf32>
    %25 = arith.addf %23, %24 : vector<8x128xf32>
    %26 = arith.mulf %19, %2 : vector<8x128xf32>
    %27 = arith.mulf %14, %20 : vector<8x128xf32>
    %28 = arith.addf %26, %27 : vector<8x128xf32>
    %29 = math.tanh %28 : vector<8x128xf32>
    %30 = arith.mulf %25, %29 : vector<8x128xf32>
    %c1_i32 = arith.constant 1 : i32
    %31 = arith.index_cast %c1_i32 : i32 to index
    %c0_11 = arith.constant 0 : index
    %c0_12 = arith.constant 0 : index
    %32 = vector.load %arg1[%31, %c0_11, %c0_12] : memref<10x8x512xf32, #tpu.memory_space<vmem>>, vector<1x8x512xf32>
    %33 = vector.shape_cast %32 : vector<1x8x512xf32> to vector<8x512xf32>
    %34 = arith.truncf %30 : vector<8x128xf32> to vector<8x128xbf16>
    %cst_13 = arith.constant dense<0.000000e+00> : vector<8x512xf32>
    %35 = tpu.matmul %34, %0, %cst_13 {dimension_numbers = #tpu.dot_dimension_numbers<[1], [0], [0], [1], [0, 0, 1, 1], [], []>} : vector<8x128xbf16>, vector<128x512xbf16>, vector<8x512xf32> -> vector<8x512xf32>
    %36 = arith.addf %33, %35 : vector<8x512xf32>
    %37 = math.tanh %36 : vector<8x512xf32>
    %38 = vector.extract_strided_slice %37 {offsets = [0, 0], sizes = [8, 128], strides = [1, 1]} : vector<8x512xf32> to vector<8x128xf32>
    %cst_14 = arith.constant 5.000000e-01 : f32
    %39 = vector.broadcast %cst_14 : f32 to vector<8x128xf32>
    %40 = arith.mulf %39, %38 : vector<8x128xf32>
    %cst_15 = arith.constant 5.000000e-01 : f32
    %41 = vector.broadcast %cst_15 : f32 to vector<8x128xf32>
    %42 = arith.addf %40, %41 : vector<8x128xf32>
    %43 = vector.extract_strided_slice %37 {offsets = [0, 128], sizes = [8, 128], strides = [1, 1]} : vector<8x512xf32> to vector<8x128xf32>
    %cst_16 = arith.constant 5.000000e-01 : f32
    %44 = vector.broadcast %cst_16 : f32 to vector<8x128xf32>
    %45 = arith.mulf %44, %43 : vector<8x128xf32>
    %cst_17 = arith.constant 5.000000e-01 : f32
    %46 = vector.broadcast %cst_17 : f32 to vector<8x128xf32>
    %47 = arith.addf %45, %46 : vector<8x128xf32>
    %48 = vector.extract_strided_slice %37 {offsets = [0, 256], sizes = [8, 128], strides = [1, 1]} : vector<8x512xf32> to vector<8x128xf32>
    %49 = vector.extract_strided_slice %37 {offsets = [0, 384], sizes = [8, 128], strides = [1, 1]} : vector<8x512xf32> to vector<8x128xf32>
    %cst_18 = arith.constant 5.000000e-01 : f32
    %50 = vector.broadcast %cst_18 : f32 to vector<8x128xf32>
    %51 = arith.mulf %50, %49 : vector<8x128xf32>
    %cst_19 = arith.constant 5.000000e-01 : f32
    %52 = vector.broadcast %cst_19 : f32 to vector<8x128xf32>
    %53 = arith.addf %51, %52 : vector<8x128xf32>
    %54 = arith.mulf %47, %28 : vector<8x128xf32>
    %55 = arith.mulf %42, %48 : vector<8x128xf32>
    %56 = arith.addf %54, %55 : vector<8x128xf32>
    %57 = math.tanh %56 : vector<8x128xf32>
    %58 = arith.mulf %53, %57 : vector<8x128xf32>
    %c2_i32 = arith.constant 2 : i32
    %59 = arith.index_cast %c2_i32 : i32 to index
    %c0_20 = arith.constant 0 : index
    %c0_21 = arith.constant 0 : index
    %60 = vector.load %arg1[%59, %c0_20, %c0_21] : memref<10x8x512xf32, #tpu.memory_space<vmem>>, vector<1x8x512xf32>
    %61 = vector.shape_cast %60 : vector<1x8x512xf32> to vector<8x512xf32>
    %62 = arith.truncf %58 : vector<8x128xf32> to vector<8x128xbf16>
    %cst_22 = arith.constant dense<0.000000e+00> : vector<8x512xf32>
    %63 = tpu.matmul %62, %0, %cst_22 {dimension_numbers = #tpu.dot_dimension_numbers<[1], [0], [0], [1], [0, 0, 1, 1], [], []>} : vector<8x128xbf16>, vector<128x512xbf16>, vector<8x512xf32> -> vector<8x512xf32>
    %64 = arith.addf %61, %63 : vector<8x512xf32>
    %65 = math.tanh %64 : vector<8x512xf32>
    %66 = vector.extract_strided_slice %65 {offsets = [0, 0], sizes = [8, 128], strides = [1, 1]} : vector<8x512xf32> to vector<8x128xf32>
    %cst_23 = arith.constant 5.000000e-01 : f32
    %67 = vector.broadcast %cst_23 : f32 to vector<8x128xf32>
    %68 = arith.mulf %67, %66 : vector<8x128xf32>
    %cst_24 = arith.constant 5.000000e-01 : f32
    %69 = vector.broadcast %cst_24 : f32 to vector<8x128xf32>
    %70 = arith.addf %68, %69 : vector<8x128xf32>
    %71 = vector.extract_strided_slice %65 {offsets = [0, 128], sizes = [8, 128], strides = [1, 1]} : vector<8x512xf32> to vector<8x128xf32>
    %cst_25 = arith.constant 5.000000e-01 : f32
    %72 = vector.broadcast %cst_25 : f32 to vector<8x128xf32>
    %73 = arith.mulf %72, %71 : vector<8x128xf32>
    %cst_26 = arith.constant 5.000000e-01 : f32
    %74 = vector.broadcast %cst_26 : f32 to vector<8x128xf32>
    %75 = arith.addf %73, %74 : vector<8x128xf32>
    %76 = vector.extract_strided_slice %65 {offsets = [0, 256], sizes = [8, 128], strides = [1, 1]} : vector<8x512xf32> to vector<8x128xf32>
    %77 = vector.extract_strided_slice %65 {offsets = [0, 384], sizes = [8, 128], strides = [1, 1]} : vector<8x512xf32> to vector<8x128xf32>
    %cst_27 = arith.constant 5.000000e-01 : f32
    %78 = vector.broadcast %cst_27 : f32 to vector<8x128xf32>
    %79 = arith.mulf %78, %77 : vector<8x128xf32>
    %cst_28 = arith.constant 5.000000e-01 : f32
    %80 = vector.broadcast %cst_28 : f32 to vector<8x128xf32>
    %81 = arith.addf %79, %80 : vector<8x128xf32>
    %82 = arith.mulf %75, %56 : vector<8x128xf32>
    %83 = arith.mulf %70, %76 : vector<8x128xf32>
    %84 = arith.addf %82, %83 : vector<8x128xf32>
    %85 = math.tanh %84 : vector<8x128xf32>
    %86 = arith.mulf %81, %85 : vector<8x128xf32>
    %c3_i32 = arith.constant 3 : i32
    %87 = arith.index_cast %c3_i32 : i32 to index
    %c0_29 = arith.constant 0 : index
    %c0_30 = arith.constant 0 : index
    %88 = vector.load %arg1[%87, %c0_29, %c0_30] : memref<10x8x512xf32, #tpu.memory_space<vmem>>, vector<1x8x512xf32>
    %89 = vector.shape_cast %88 : vector<1x8x512xf32> to vector<8x512xf32>
    %90 = arith.truncf %86 : vector<8x128xf32> to vector<8x128xbf16>
    %cst_31 = arith.constant dense<0.000000e+00> : vector<8x512xf32>
    %91 = tpu.matmul %90, %0, %cst_31 {dimension_numbers = #tpu.dot_dimension_numbers<[1], [0], [0], [1], [0, 0, 1, 1], [], []>} : vector<8x128xbf16>, vector<128x512xbf16>, vector<8x512xf32> -> vector<8x512xf32>
    %92 = arith.addf %89, %91 : vector<8x512xf32>
    %93 = math.tanh %92 : vector<8x512xf32>
    %94 = vector.extract_strided_slice %93 {offsets = [0, 0], sizes = [8, 128], strides = [1, 1]} : vector<8x512xf32> to vector<8x128xf32>
    %cst_32 = arith.constant 5.000000e-01 : f32
    %95 = vector.broadcast %cst_32 : f32 to vector<8x128xf32>
    %96 = arith.mulf %95, %94 : vector<8x128xf32>
    %cst_33 = arith.constant 5.000000e-01 : f32
    %97 = vector.broadcast %cst_33 : f32 to vector<8x128xf32>
    %98 = arith.addf %96, %97 : vector<8x128xf32>
    %99 = vector.extract_strided_slice %93 {offsets = [0, 128], sizes = [8, 128], strides = [1, 1]} : vector<8x512xf32> to vector<8x128xf32>
    %cst_34 = arith.constant 5.000000e-01 : f32
    %100 = vector.broadcast %cst_34 : f32 to vector<8x128xf32>
    %101 = arith.mulf %100, %99 : vector<8x128xf32>
    %cst_35 = arith.constant 5.000000e-01 : f32
    %102 = vector.broadcast %cst_35 : f32 to vector<8x128xf32>
    %103 = arith.addf %101, %102 : vector<8x128xf32>
    %104 = vector.extract_strided_slice %93 {offsets = [0, 256], sizes = [8, 128], strides = [1, 1]} : vector<8x512xf32> to vector<8x128xf32>
    %105 = vector.extract_strided_slice %93 {offsets = [0, 384], sizes = [8, 128], strides = [1, 1]} : vector<8x512xf32> to vector<8x128xf32>
    %cst_36 = arith.constant 5.000000e-01 : f32
    %106 = vector.broadcast %cst_36 : f32 to vector<8x128xf32>
    %107 = arith.mulf %106, %105 : vector<8x128xf32>
    %cst_37 = arith.constant 5.000000e-01 : f32
    %108 = vector.broadcast %cst_37 : f32 to vector<8x128xf32>
    %109 = arith.addf %107, %108 : vector<8x128xf32>
    %110 = arith.mulf %103, %84 : vector<8x128xf32>
    %111 = arith.mulf %98, %104 : vector<8x128xf32>
    %112 = arith.addf %110, %111 : vector<8x128xf32>
    %113 = math.tanh %112 : vector<8x128xf32>
    %114 = arith.mulf %109, %113 : vector<8x128xf32>
    %c4_i32 = arith.constant 4 : i32
    %115 = arith.index_cast %c4_i32 : i32 to index
    %c0_38 = arith.constant 0 : index
    %c0_39 = arith.constant 0 : index
    %116 = vector.load %arg1[%115, %c0_38, %c0_39] : memref<10x8x512xf32, #tpu.memory_space<vmem>>, vector<1x8x512xf32>
    %117 = vector.shape_cast %116 : vector<1x8x512xf32> to vector<8x512xf32>
    %118 = arith.truncf %114 : vector<8x128xf32> to vector<8x128xbf16>
    %cst_40 = arith.constant dense<0.000000e+00> : vector<8x512xf32>
    %119 = tpu.matmul %118, %0, %cst_40 {dimension_numbers = #tpu.dot_dimension_numbers<[1], [0], [0], [1], [0, 0, 1, 1], [], []>} : vector<8x128xbf16>, vector<128x512xbf16>, vector<8x512xf32> -> vector<8x512xf32>
    %120 = arith.addf %117, %119 : vector<8x512xf32>
    %121 = math.tanh %120 : vector<8x512xf32>
    %122 = vector.extract_strided_slice %121 {offsets = [0, 0], sizes = [8, 128], strides = [1, 1]} : vector<8x512xf32> to vector<8x128xf32>
    %cst_41 = arith.constant 5.000000e-01 : f32
    %123 = vector.broadcast %cst_41 : f32 to vector<8x128xf32>
    %124 = arith.mulf %123, %122 : vector<8x128xf32>
    %cst_42 = arith.constant 5.000000e-01 : f32
    %125 = vector.broadcast %cst_42 : f32 to vector<8x128xf32>
    %126 = arith.addf %124, %125 : vector<8x128xf32>
    %127 = vector.extract_strided_slice %121 {offsets = [0, 128], sizes = [8, 128], strides = [1, 1]} : vector<8x512xf32> to vector<8x128xf32>
    %cst_43 = arith.constant 5.000000e-01 : f32
    %128 = vector.broadcast %cst_43 : f32 to vector<8x128xf32>
    %129 = arith.mulf %128, %127 : vector<8x128xf32>
    %cst_44 = arith.constant 5.000000e-01 : f32
    %130 = vector.broadcast %cst_44 : f32 to vector<8x128xf32>
    %131 = arith.addf %129, %130 : vector<8x128xf32>
    %132 = vector.extract_strided_slice %121 {offsets = [0, 256], sizes = [8, 128], strides = [1, 1]} : vector<8x512xf32> to vector<8x128xf32>
    %133 = vector.extract_strided_slice %121 {offsets = [0, 384], sizes = [8, 128], strides = [1, 1]} : vector<8x512xf32> to vector<8x128xf32>
    %cst_45 = arith.constant 5.000000e-01 : f32
    %134 = vector.broadcast %cst_45 : f32 to vector<8x128xf32>
    %135 = arith.mulf %134, %133 : vector<8x128xf32>
    %cst_46 = arith.constant 5.000000e-01 : f32
    %136 = vector.broadcast %cst_46 : f32 to vector<8x128xf32>
    %137 = arith.addf %135, %136 : vector<8x128xf32>
    %138 = arith.mulf %131, %112 : vector<8x128xf32>
    %139 = arith.mulf %126, %132 : vector<8x128xf32>
    %140 = arith.addf %138, %139 : vector<8x128xf32>
    %141 = math.tanh %140 : vector<8x128xf32>
    %142 = arith.mulf %137, %141 : vector<8x128xf32>
    %c5_i32 = arith.constant 5 : i32
    %143 = arith.index_cast %c5_i32 : i32 to index
    %c0_47 = arith.constant 0 : index
    %c0_48 = arith.constant 0 : index
    %144 = vector.load %arg1[%143, %c0_47, %c0_48] : memref<10x8x512xf32, #tpu.memory_space<vmem>>, vector<1x8x512xf32>
    %145 = vector.shape_cast %144 : vector<1x8x512xf32> to vector<8x512xf32>
    %146 = arith.truncf %142 : vector<8x128xf32> to vector<8x128xbf16>
    %cst_49 = arith.constant dense<0.000000e+00> : vector<8x512xf32>
    %147 = tpu.matmul %146, %0, %cst_49 {dimension_numbers = #tpu.dot_dimension_numbers<[1], [0], [0], [1], [0, 0, 1, 1], [], []>} : vector<8x128xbf16>, vector<128x512xbf16>, vector<8x512xf32> -> vector<8x512xf32>
    %148 = arith.addf %145, %147 : vector<8x512xf32>
    %149 = math.tanh %148 : vector<8x512xf32>
    %150 = vector.extract_strided_slice %149 {offsets = [0, 0], sizes = [8, 128], strides = [1, 1]} : vector<8x512xf32> to vector<8x128xf32>
    %cst_50 = arith.constant 5.000000e-01 : f32
    %151 = vector.broadcast %cst_50 : f32 to vector<8x128xf32>
    %152 = arith.mulf %151, %150 : vector<8x128xf32>
    %cst_51 = arith.constant 5.000000e-01 : f32
    %153 = vector.broadcast %cst_51 : f32 to vector<8x128xf32>
    %154 = arith.addf %152, %153 : vector<8x128xf32>
    %155 = vector.extract_strided_slice %149 {offsets = [0, 128], sizes = [8, 128], strides = [1, 1]} : vector<8x512xf32> to vector<8x128xf32>
    %cst_52 = arith.constant 5.000000e-01 : f32
    %156 = vector.broadcast %cst_52 : f32 to vector<8x128xf32>
    %157 = arith.mulf %156, %155 : vector<8x128xf32>
    %cst_53 = arith.constant 5.000000e-01 : f32
    %158 = vector.broadcast %cst_53 : f32 to vector<8x128xf32>
    %159 = arith.addf %157, %158 : vector<8x128xf32>
    %160 = vector.extract_strided_slice %149 {offsets = [0, 256], sizes = [8, 128], strides = [1, 1]} : vector<8x512xf32> to vector<8x128xf32>
    %161 = vector.extract_strided_slice %149 {offsets = [0, 384], sizes = [8, 128], strides = [1, 1]} : vector<8x512xf32> to vector<8x128xf32>
    %cst_54 = arith.constant 5.000000e-01 : f32
    %162 = vector.broadcast %cst_54 : f32 to vector<8x128xf32>
    %163 = arith.mulf %162, %161 : vector<8x128xf32>
    %cst_55 = arith.constant 5.000000e-01 : f32
    %164 = vector.broadcast %cst_55 : f32 to vector<8x128xf32>
    %165 = arith.addf %163, %164 : vector<8x128xf32>
    %166 = arith.mulf %159, %140 : vector<8x128xf32>
    %167 = arith.mulf %154, %160 : vector<8x128xf32>
    %168 = arith.addf %166, %167 : vector<8x128xf32>
    %169 = math.tanh %168 : vector<8x128xf32>
    %170 = arith.mulf %165, %169 : vector<8x128xf32>
    %c6_i32 = arith.constant 6 : i32
    %171 = arith.index_cast %c6_i32 : i32 to index
    %c0_56 = arith.constant 0 : index
    %c0_57 = arith.constant 0 : index
    %172 = vector.load %arg1[%171, %c0_56, %c0_57] : memref<10x8x512xf32, #tpu.memory_space<vmem>>, vector<1x8x512xf32>
    %173 = vector.shape_cast %172 : vector<1x8x512xf32> to vector<8x512xf32>
    %174 = arith.truncf %170 : vector<8x128xf32> to vector<8x128xbf16>
    %cst_58 = arith.constant dense<0.000000e+00> : vector<8x512xf32>
    %175 = tpu.matmul %174, %0, %cst_58 {dimension_numbers = #tpu.dot_dimension_numbers<[1], [0], [0], [1], [0, 0, 1, 1], [], []>} : vector<8x128xbf16>, vector<128x512xbf16>, vector<8x512xf32> -> vector<8x512xf32>
    %176 = arith.addf %173, %175 : vector<8x512xf32>
    %177 = math.tanh %176 : vector<8x512xf32>
    %178 = vector.extract_strided_slice %177 {offsets = [0, 0], sizes = [8, 128], strides = [1, 1]} : vector<8x512xf32> to vector<8x128xf32>
    %cst_59 = arith.constant 5.000000e-01 : f32
    %179 = vector.broadcast %cst_59 : f32 to vector<8x128xf32>
    %180 = arith.mulf %179, %178 : vector<8x128xf32>
    %cst_60 = arith.constant 5.000000e-01 : f32
    %181 = vector.broadcast %cst_60 : f32 to vector<8x128xf32>
    %182 = arith.addf %180, %181 : vector<8x128xf32>
    %183 = vector.extract_strided_slice %177 {offsets = [0, 128], sizes = [8, 128], strides = [1, 1]} : vector<8x512xf32> to vector<8x128xf32>
    %cst_61 = arith.constant 5.000000e-01 : f32
    %184 = vector.broadcast %cst_61 : f32 to vector<8x128xf32>
    %185 = arith.mulf %184, %183 : vector<8x128xf32>
    %cst_62 = arith.constant 5.000000e-01 : f32
    %186 = vector.broadcast %cst_62 : f32 to vector<8x128xf32>
    %187 = arith.addf %185, %186 : vector<8x128xf32>
    %188 = vector.extract_strided_slice %177 {offsets = [0, 256], sizes = [8, 128], strides = [1, 1]} : vector<8x512xf32> to vector<8x128xf32>
    %189 = vector.extract_strided_slice %177 {offsets = [0, 384], sizes = [8, 128], strides = [1, 1]} : vector<8x512xf32> to vector<8x128xf32>
    %cst_63 = arith.constant 5.000000e-01 : f32
    %190 = vector.broadcast %cst_63 : f32 to vector<8x128xf32>
    %191 = arith.mulf %190, %189 : vector<8x128xf32>
    %cst_64 = arith.constant 5.000000e-01 : f32
    %192 = vector.broadcast %cst_64 : f32 to vector<8x128xf32>
    %193 = arith.addf %191, %192 : vector<8x128xf32>
    %194 = arith.mulf %187, %168 : vector<8x128xf32>
    %195 = arith.mulf %182, %188 : vector<8x128xf32>
    %196 = arith.addf %194, %195 : vector<8x128xf32>
    %197 = math.tanh %196 : vector<8x128xf32>
    %198 = arith.mulf %193, %197 : vector<8x128xf32>
    %c7_i32 = arith.constant 7 : i32
    %199 = arith.index_cast %c7_i32 : i32 to index
    %c0_65 = arith.constant 0 : index
    %c0_66 = arith.constant 0 : index
    %200 = vector.load %arg1[%199, %c0_65, %c0_66] : memref<10x8x512xf32, #tpu.memory_space<vmem>>, vector<1x8x512xf32>
    %201 = vector.shape_cast %200 : vector<1x8x512xf32> to vector<8x512xf32>
    %202 = arith.truncf %198 : vector<8x128xf32> to vector<8x128xbf16>
    %cst_67 = arith.constant dense<0.000000e+00> : vector<8x512xf32>
    %203 = tpu.matmul %202, %0, %cst_67 {dimension_numbers = #tpu.dot_dimension_numbers<[1], [0], [0], [1], [0, 0, 1, 1], [], []>} : vector<8x128xbf16>, vector<128x512xbf16>, vector<8x512xf32> -> vector<8x512xf32>
    %204 = arith.addf %201, %203 : vector<8x512xf32>
    %205 = math.tanh %204 : vector<8x512xf32>
    %206 = vector.extract_strided_slice %205 {offsets = [0, 0], sizes = [8, 128], strides = [1, 1]} : vector<8x512xf32> to vector<8x128xf32>
    %cst_68 = arith.constant 5.000000e-01 : f32
    %207 = vector.broadcast %cst_68 : f32 to vector<8x128xf32>
    %208 = arith.mulf %207, %206 : vector<8x128xf32>
    %cst_69 = arith.constant 5.000000e-01 : f32
    %209 = vector.broadcast %cst_69 : f32 to vector<8x128xf32>
    %210 = arith.addf %208, %209 : vector<8x128xf32>
    %211 = vector.extract_strided_slice %205 {offsets = [0, 128], sizes = [8, 128], strides = [1, 1]} : vector<8x512xf32> to vector<8x128xf32>
    %cst_70 = arith.constant 5.000000e-01 : f32
    %212 = vector.broadcast %cst_70 : f32 to vector<8x128xf32>
    %213 = arith.mulf %212, %211 : vector<8x128xf32>
    %cst_71 = arith.constant 5.000000e-01 : f32
    %214 = vector.broadcast %cst_71 : f32 to vector<8x128xf32>
    %215 = arith.addf %213, %214 : vector<8x128xf32>
    %216 = vector.extract_strided_slice %205 {offsets = [0, 256], sizes = [8, 128], strides = [1, 1]} : vector<8x512xf32> to vector<8x128xf32>
    %217 = vector.extract_strided_slice %205 {offsets = [0, 384], sizes = [8, 128], strides = [1, 1]} : vector<8x512xf32> to vector<8x128xf32>
    %cst_72 = arith.constant 5.000000e-01 : f32
    %218 = vector.broadcast %cst_72 : f32 to vector<8x128xf32>
    %219 = arith.mulf %218, %217 : vector<8x128xf32>
    %cst_73 = arith.constant 5.000000e-01 : f32
    %220 = vector.broadcast %cst_73 : f32 to vector<8x128xf32>
    %221 = arith.addf %219, %220 : vector<8x128xf32>
    %222 = arith.mulf %215, %196 : vector<8x128xf32>
    %223 = arith.mulf %210, %216 : vector<8x128xf32>
    %224 = arith.addf %222, %223 : vector<8x128xf32>
    %225 = math.tanh %224 : vector<8x128xf32>
    %226 = arith.mulf %221, %225 : vector<8x128xf32>
    %c8_i32 = arith.constant 8 : i32
    %227 = arith.index_cast %c8_i32 : i32 to index
    %c0_74 = arith.constant 0 : index
    %c0_75 = arith.constant 0 : index
    %228 = vector.load %arg1[%227, %c0_74, %c0_75] : memref<10x8x512xf32, #tpu.memory_space<vmem>>, vector<1x8x512xf32>
    %229 = vector.shape_cast %228 : vector<1x8x512xf32> to vector<8x512xf32>
    %230 = arith.truncf %226 : vector<8x128xf32> to vector<8x128xbf16>
    %cst_76 = arith.constant dense<0.000000e+00> : vector<8x512xf32>
    %231 = tpu.matmul %230, %0, %cst_76 {dimension_numbers = #tpu.dot_dimension_numbers<[1], [0], [0], [1], [0, 0, 1, 1], [], []>} : vector<8x128xbf16>, vector<128x512xbf16>, vector<8x512xf32> -> vector<8x512xf32>
    %232 = arith.addf %229, %231 : vector<8x512xf32>
    %233 = math.tanh %232 : vector<8x512xf32>
    %234 = vector.extract_strided_slice %233 {offsets = [0, 0], sizes = [8, 128], strides = [1, 1]} : vector<8x512xf32> to vector<8x128xf32>
    %cst_77 = arith.constant 5.000000e-01 : f32
    %235 = vector.broadcast %cst_77 : f32 to vector<8x128xf32>
    %236 = arith.mulf %235, %234 : vector<8x128xf32>
    %cst_78 = arith.constant 5.000000e-01 : f32
    %237 = vector.broadcast %cst_78 : f32 to vector<8x128xf32>
    %238 = arith.addf %236, %237 : vector<8x128xf32>
    %239 = vector.extract_strided_slice %233 {offsets = [0, 128], sizes = [8, 128], strides = [1, 1]} : vector<8x512xf32> to vector<8x128xf32>
    %cst_79 = arith.constant 5.000000e-01 : f32
    %240 = vector.broadcast %cst_79 : f32 to vector<8x128xf32>
    %241 = arith.mulf %240, %239 : vector<8x128xf32>
    %cst_80 = arith.constant 5.000000e-01 : f32
    %242 = vector.broadcast %cst_80 : f32 to vector<8x128xf32>
    %243 = arith.addf %241, %242 : vector<8x128xf32>
    %244 = vector.extract_strided_slice %233 {offsets = [0, 256], sizes = [8, 128], strides = [1, 1]} : vector<8x512xf32> to vector<8x128xf32>
    %245 = vector.extract_strided_slice %233 {offsets = [0, 384], sizes = [8, 128], strides = [1, 1]} : vector<8x512xf32> to vector<8x128xf32>
    %cst_81 = arith.constant 5.000000e-01 : f32
    %246 = vector.broadcast %cst_81 : f32 to vector<8x128xf32>
    %247 = arith.mulf %246, %245 : vector<8x128xf32>
    %cst_82 = arith.constant 5.000000e-01 : f32
    %248 = vector.broadcast %cst_82 : f32 to vector<8x128xf32>
    %249 = arith.addf %247, %248 : vector<8x128xf32>
    %250 = arith.mulf %243, %224 : vector<8x128xf32>
    %251 = arith.mulf %238, %244 : vector<8x128xf32>
    %252 = arith.addf %250, %251 : vector<8x128xf32>
    %253 = math.tanh %252 : vector<8x128xf32>
    %254 = arith.mulf %249, %253 : vector<8x128xf32>
    %c9_i32 = arith.constant 9 : i32
    %255 = arith.index_cast %c9_i32 : i32 to index
    %c0_83 = arith.constant 0 : index
    %c0_84 = arith.constant 0 : index
    %256 = vector.load %arg1[%255, %c0_83, %c0_84] : memref<10x8x512xf32, #tpu.memory_space<vmem>>, vector<1x8x512xf32>
    %257 = vector.shape_cast %256 : vector<1x8x512xf32> to vector<8x512xf32>
    %258 = arith.truncf %254 : vector<8x128xf32> to vector<8x128xbf16>
    %cst_85 = arith.constant dense<0.000000e+00> : vector<8x512xf32>
    %259 = tpu.matmul %258, %0, %cst_85 {dimension_numbers = #tpu.dot_dimension_numbers<[1], [0], [0], [1], [0, 0, 1, 1], [], []>} : vector<8x128xbf16>, vector<128x512xbf16>, vector<8x512xf32> -> vector<8x512xf32>
    %260 = arith.addf %257, %259 : vector<8x512xf32>
    %261 = math.tanh %260 : vector<8x512xf32>
    %262 = vector.extract_strided_slice %261 {offsets = [0, 0], sizes = [8, 128], strides = [1, 1]} : vector<8x512xf32> to vector<8x128xf32>
    %cst_86 = arith.constant 5.000000e-01 : f32
    %263 = vector.broadcast %cst_86 : f32 to vector<8x128xf32>
    %264 = arith.mulf %263, %262 : vector<8x128xf32>
    %cst_87 = arith.constant 5.000000e-01 : f32
    %265 = vector.broadcast %cst_87 : f32 to vector<8x128xf32>
    %266 = arith.addf %264, %265 : vector<8x128xf32>
    %267 = vector.extract_strided_slice %261 {offsets = [0, 128], sizes = [8, 128], strides = [1, 1]} : vector<8x512xf32> to vector<8x128xf32>
    %cst_88 = arith.constant 5.000000e-01 : f32
    %268 = vector.broadcast %cst_88 : f32 to vector<8x128xf32>
    %269 = arith.mulf %268, %267 : vector<8x128xf32>
    %cst_89 = arith.constant 5.000000e-01 : f32
    %270 = vector.broadcast %cst_89 : f32 to vector<8x128xf32>
    %271 = arith.addf %269, %270 : vector<8x128xf32>
    %272 = vector.extract_strided_slice %261 {offsets = [0, 256], sizes = [8, 128], strides = [1, 1]} : vector<8x512xf32> to vector<8x128xf32>
    %273 = vector.extract_strided_slice %261 {offsets = [0, 384], sizes = [8, 128], strides = [1, 1]} : vector<8x512xf32> to vector<8x128xf32>
    %cst_90 = arith.constant 5.000000e-01 : f32
    %274 = vector.broadcast %cst_90 : f32 to vector<8x128xf32>
    %275 = arith.mulf %274, %273 : vector<8x128xf32>
    %cst_91 = arith.constant 5.000000e-01 : f32
    %276 = vector.broadcast %cst_91 : f32 to vector<8x128xf32>
    %277 = arith.addf %275, %276 : vector<8x128xf32>
    %278 = arith.mulf %271, %252 : vector<8x128xf32>
    %279 = arith.mulf %266, %272 : vector<8x128xf32>
    %280 = arith.addf %278, %279 : vector<8x128xf32>
    %281 = math.tanh %280 : vector<8x128xf32>
    %282 = arith.mulf %277, %281 : vector<8x128xf32>
    %c10_i32 = arith.constant 10 : i32
    %283 = arith.truncf %282 : vector<8x128xf32> to vector<8x128xbf16>
    %c0_92 = arith.constant 0 : index
    %c0_93 = arith.constant 0 : index
    %284 = vector.load %arg3[%c0_92, %c0_93] : memref<128x128xbf16, #tpu.memory_space<vmem>>, vector<128x128xbf16>
    %cst_94 = arith.constant dense<0.000000e+00> : vector<8x128xf32>
    %285 = tpu.matmul %283, %284, %cst_94 {dimension_numbers = #tpu.dot_dimension_numbers<[1], [0], [0], [1], [0, 0, 1, 1], [], []>} : vector<8x128xbf16>, vector<128x128xbf16>, vector<8x128xf32> -> vector<8x128xf32>
    %c0_95 = arith.constant 0 : index
    %c0_96 = arith.constant 0 : index
    %286 = vector.load %arg4[%c0_95, %c0_96] : memref<1x128xf32, #tpu.memory_space<vmem>>, vector<1x128xf32>
    %287 = vector.broadcast %286 : vector<1x128xf32> to vector<8x128xf32>
    %288 = arith.addf %285, %287 : vector<8x128xf32>
    %c0_97 = arith.constant 0 : index
    %c0_98 = arith.constant 0 : index
    %289 = vector.load %arg5[%c0_97, %c0_98] : memref<8x128xf32, #tpu.memory_space<vmem>>, vector<8x128xf32>
    tpu.vector_store %arg5[%c0_97, %c0_98], %288 {strides = array<i32>} : memref<8x128xf32, #tpu.memory_space<vmem>>, vector<8x128xf32>,
    return
  }
  func.func @transform_0(%arg0: i32) -> (i32, i32, i32) {
    %c0_i32 = arith.constant 0 : i32
    %c0_i32_0 = arith.constant 0 : i32
    %c0_i32_1 = arith.constant 0 : i32
    return %c0_i32, %arg0, %c0_i32_0 : i32, i32, i32
  }
  func.func @transform_1(%arg0: i32) -> (i32, i32) {
    %c0_i32 = arith.constant 0 : i32
    %c0_i32_0 = arith.constant 0 : i32
    %c0_i32_1 = arith.constant 0 : i32
    return %c0_i32, %c0_i32_0 : i32, i32
  }
  func.func @transform_2(%arg0: i32) -> (i32, i32) {
    %c0_i32 = arith.constant 0 : i32
    %c0_i32_0 = arith.constant 0 : i32
    %c0_i32_1 = arith.constant 0 : i32
    return %c0_i32, %c0_i32_0 : i32, i32
  }
  func.func @transform_3(%arg0: i32) -> (i32, i32) {
    %c0_i32 = arith.constant 0 : i32
    %c0_i32_0 = arith.constant 0 : i32
    %c0_i32_1 = arith.constant 0 : i32
    return %c0_i32, %c0_i32_0 : i32, i32
  }
  func.func @transform_4(%arg0: i32) -> (i32, i32) {
    %c0_i32 = arith.constant 0 : i32
    %c0_i32_0 = arith.constant 0 : i32
    return %arg0, %c0_i32 : i32, i32
  }
}

</mosaic_0001>

<bundles_post_ra>
// kernel: lstm_forward.1
= control target key start
LH: loop header
LB: loop body
LE: loop exit
PB: predicated region body
PF: predicated region fallthrough
CT: control target
= control target key end

     0   :  { %v1692_v1 = vmov 0   ;;  %vm1694_vm0 = vmmov 0   ;;  %s2568_s1 = inlined_call_operand.vmem [shape: bf16[128,512], index: 1, kind: input, shape index: {}]   ;;  %s2569_s0 = inlined_call_operand.vmem [shape: f32[10,8,512], index: 0, kind: input, shape index: {}]   ;;  %s2570_s2 = inlined_call_operand.vmem [shape: bf16[128,128], index: 2, kind: input, shape index: {}]   ;;  %s2571_s3 = inlined_call_operand.vmem [shape: f32[1,128], index: 3, kind: input, shape index: {}]   ;;  %s2572_s4 = inlined_call_operand.vmem [shape: f32[8,128], index: 4, kind: output, shape index: {}]  }
   0x1   :  { %v1723_v0 = vld [vmem:[%s2568_s1 + $0x4] ss:$16 sps:$4 sm:$0xff]   ;;  %246 = vmatprep.mubr.bf16.mxu0 %v1692_v1  ;;  %287 = vmatprep.mubr.bf16.mxu1 %v1692_v1  ;;  %v1730_v2 = vld [vmem:[%s2568_s1] ss:$16 sps:$4 sm:$0xff]   ;;  %v1736_v3 = vld [vmem:[%s2568_s1 + $0xc] ss:$16 sps:$4 sm:$0xff]  }
   0x2   :  { %214 = vmatprep.subr.bf16.mxu0 %v1723_v0  ;;  %v1741_v4 = vld [vmem:[%s2568_s1 + $0x8] ss:$16 sps:$4 sm:$0xff]   ;;  %v1747_v5 = vld [vmem:[%s2568_s1 + $0x24] ss:$16 sps:$4 sm:$0xff]   ;;  %v1752_v6 = vld [vmem:[%s2568_s1 + $0x20] ss:$16 sps:$4 sm:$0xff]   ;;  %255 = vmatprep.subr.bf16.mxu1 %v1736_v3 }
   0x3   :  { %215 = vmatpush1.bf16.msra.mxu0 %v1730_v2  ;;  %v1758_v7 = vld [vmem:[%s2568_s1 + $0x2c] ss:$16 sps:$4 sm:$0xff]   ;;  %256 = vmatpush1.bf16.msra.mxu1 %v1741_v4  ;;  %v1765_v8 = vld [vmem:[%s2568_s1 + $0x28] ss:$16 sps:$4 sm:$0xff]   ;;  %v1771_v9 = vld [vmem:[%s2568_s1 + $0x44] ss:$16 sps:$4 sm:$0xff]  }
   0x4   :  { %216 = vmatprep.subr.bf16.mxu0 %v1747_v5  ;;  %257 = vmatprep.subr.bf16.mxu1 %v1758_v7  ;;  %v1777_v10 = vld [vmem:[%s2568_s1 + $0x40] ss:$16 sps:$4 sm:$0xff]   ;;  %v1782_v11 = vld [vmem:[%s2568_s1 + $0x4c] ss:$16 sps:$4 sm:$0xff]   ;;  %v1788_v12 = vld [vmem:[%s2568_s1 + $0x64] ss:$16 sps:$4 sm:$0xff]  }
   0x5   :  { %v1794_v13 = vld [vmem:[%s2568_s1 + $0x48] ss:$16 sps:$4 sm:$0xff]   ;;  %v1800_v14 = vld [vmem:[%s2568_s1 + $0x6c] ss:$16 sps:$4 sm:$0xff]   ;;  %v1806_v15 = vld [vmem:[%s2568_s1 + $0x60] ss:$16 sps:$4 sm:$0xff]  }
   0x6   :  { %v1812_v16 = vld [vmem:[%s2568_s1 + $0x84] ss:$16 sps:$4 sm:$0xff]   ;;  %v1818_v17 = vld [vmem:[%s2568_s1 + $0x68] ss:$16 sps:$4 sm:$0xff]   ;;  %v1824_v18 = vld [vmem:[%s2568_s1 + $0x8c] ss:$16 sps:$4 sm:$0xff]  }
   0x7   :  { %217 = vmatpush1.bf16.msra.mxu0 %v1752_v6  ;;  %258 = vmatpush1.bf16.msra.mxu1 %v1765_v8  ;;  %v1830_v19 = vld [vmem:[%s2568_s1 + $0x80] ss:$16 sps:$4 sm:$0xff]   ;;  %v1836_v20 = vld [vmem:[%s2568_s1 + $0xa4] ss:$16 sps:$4 sm:$0xff]   ;;  %v1842_v21 = vld [vmem:[%s2568_s1 + $0x88] ss:$16 sps:$4 sm:$0xff]  }
   0x8   :  { %218 = vmatprep.subr.bf16.mxu0 %v1771_v9  ;;  %259 = vmatprep.subr.bf16.mxu1 %v1782_v11  ;;  %v1848_v22 = vld [vmem:[%s2568_s1 + $0xac] ss:$16 sps:$4 sm:$0xff]   ;;  %v1854_v23 = vld [vmem:[%s2568_s1 + $0xa0] ss:$16 sps:$4 sm:$0xff]   ;;  %v1860_v24 = vld [vmem:[%s2568_s1 + $0xc4] ss:$16 sps:$4 sm:$0xff]  }
   0x9   :  { %v1866_v25 = vld [vmem:[%s2568_s1 + $0xa8] ss:$16 sps:$4 sm:$0xff]   ;;  %v1872_v26 = vld [vmem:[%s2568_s1 + $0xcc] ss:$16 sps:$4 sm:$0xff]   ;;  %v1878_v27 = vld [vmem:[%s2568_s1 + $0xc0] ss:$16 sps:$4 sm:$0xff]  }
   0xa   :  { %v1884_v28 = vld [vmem:[%s2568_s1 + $0xe4] ss:$16 sps:$4 sm:$0xff]   ;;  %v1890_v29 = vld [vmem:[%s2568_s1 + $0xc8] ss:$16 sps:$4 sm:$0xff]   ;;  %v1896_v30 = vld [vmem:[%s2568_s1 + $0xec] ss:$16 sps:$4 sm:$0xff]  }
   0xb   :  { %219 = vmatpush1.bf16.msra.mxu0 %v1777_v10  ;;  %260 = vmatpush1.bf16.msra.mxu1 %v1794_v13  ;;  %v1902_v31 = vld [vmem:[%s2568_s1 + $0xe0] ss:$16 sps:$4 sm:$0xff]   ;;  %v1909_v32 = vld [vmem:[%s2568_s1 + $0xe8] ss:$16 sps:$4 sm:$0xff]  }
   0xc   :  { %220 = vmatprep.subr.bf16.mxu0 %v1788_v12  ;;  %261 = vmatprep.subr.bf16.mxu1 %v1800_v14  ;;  %v50_v33 = vld [vmem:[%s2569_s0] sm:$0xff]  ;;  %v51_v34 = vld [vmem:[%s2569_s0 + $0x8] sm:$0xff]  ;;  %v52_v36 = vld [vmem:[%s2569_s0 + $0x10] sm:$0xff] }
   0xd   :  { %v53_v47 = vld [vmem:[%s2569_s0 + $0x18] sm:$0xff] }
   0xf   :  { %221 = vmatpush1.bf16.msra.mxu0 %v1806_v15  ;;  %262 = vmatpush1.bf16.msra.mxu1 %v1818_v17 }
  0x10   :  { %222 = vmatprep.subr.bf16.mxu0 %v1812_v16  ;;  %263 = vmatprep.subr.bf16.mxu1 %v1824_v18 }
  0x13   :  { %223 = vmatpush1.bf16.msra.mxu0 %v1830_v19  ;;  %264 = vmatpush1.bf16.msra.mxu1 %v1842_v21 }
  0x14   :  { %224 = vmatprep.subr.bf16.mxu0 %v1836_v20  ;;  %265 = vmatprep.subr.bf16.mxu1 %v1848_v22 }
  0x17   :  { %225 = vmatpush1.bf16.msra.mxu0 %v1854_v23  ;;  %266 = vmatpush1.bf16.msra.mxu1 %v1866_v25 }
  0x18   :  { %226 = vmatprep.subr.bf16.mxu0 %v1860_v24  ;;  %267 = vmatprep.subr.bf16.mxu1 %v1872_v26 }
  0x1b   :  { %227 = vmatpush1.bf16.msra.mxu0 %v1878_v27  ;;  %268 = vmatpush1.bf16.msra.mxu1 %v1890_v29 }
  0x1c   :  { %228 = vmatprep.subr.bf16.mxu0 %v1884_v28  ;;  %269 = vmatprep.subr.bf16.mxu1 %v1896_v30 }
  0x1f   :  { %229 = vmatpush1.bf16.msra.mxu0 %v1902_v31  ;;  %270 = vmatpush1.bf16.msra.mxu1 %v1909_v32 }
  0x20   :  { %321 = vmatprep.subr.bf16.mxu0 %v1723_v0  ;;  %362 = vmatprep.subr.bf16.mxu1 %v1736_v3 }
  0x22   :  { %247 = vmatmul.mubr.bf16.vlgmr.msra.gmra.mrb[0].mxu0 %v1692_v1  ;;  %288 = vmatmul.mubr.bf16.vlgmr.msra.gmra.mrb[0].mxu1 %v1692_v1 }
  0x23   :  { %322 = vmatpush1.bf16.msra.mxu0 %v1730_v2  ;;  %353 = vmatprep.mubr.bf16.mxu0 %v1692_v1 }
  0x24   :  { %323 = vmatprep.subr.bf16.mxu0 %v1747_v5  ;;  %363 = vmatpush1.bf16.msra.mxu1 %v1741_v4 }
  0x25   :  { %394 = vmatprep.mubr.bf16.mxu1 %v1692_v1  ;;  %364 = vmatprep.subr.bf16.mxu1 %v1758_v7 }
  0x27   :  { %324 = vmatpush1.bf16.msra.mxu0 %v1752_v6 }
  0x28   :  { %325 = vmatprep.subr.bf16.mxu0 %v1771_v9  ;;  %365 = vmatpush1.bf16.msra.mxu1 %v1765_v8 }
  0x29   :  { %366 = vmatprep.subr.bf16.mxu1 %v1782_v11 }
  0x2b   :  { %326 = vmatpush1.bf16.msra.mxu0 %v1777_v10 }
  0x2c   :  { %327 = vmatprep.subr.bf16.mxu0 %v1788_v12  ;;  %367 = vmatpush1.bf16.msra.mxu1 %v1794_v13 }
  0x2d   :  { %368 = vmatprep.subr.bf16.mxu1 %v1800_v14 }
  0x2f   :  { %328 = vmatpush1.bf16.msra.mxu0 %v1806_v15 }
  0x30   :  { %329 = vmatprep.subr.bf16.mxu0 %v1812_v16  ;;  %369 = vmatpush1.bf16.msra.mxu1 %v1818_v17 }
  0x31   :  { %370 = vmatprep.subr.bf16.mxu1 %v1824_v18 }
  0x33   :  { %330 = vmatpush1.bf16.msra.mxu0 %v1830_v19 }
  0x34   :  { %331 = vmatprep.subr.bf16.mxu0 %v1836_v20  ;;  %371 = vmatpush1.bf16.msra.mxu1 %v1842_v21 }
  0x35   :  { %372 = vmatprep.subr.bf16.mxu1 %v1848_v22 }
  0x37   :  { %332 = vmatpush1.bf16.msra.mxu0 %v1854_v23 }
  0x38   :  { %333 = vmatprep.subr.bf16.mxu0 %v1860_v24  ;;  %373 = vmatpush1.bf16.msra.mxu1 %v1866_v25 }
  0x39   :  { %374 = vmatprep.subr.bf16.mxu1 %v1872_v26 }
  0x3b   :  { %334 = vmatpush1.bf16.msra.mxu0 %v1878_v27 }
  0x3c   :  { %335 = vmatprep.subr.bf16.mxu0 %v1884_v28  ;;  %375 = vmatpush1.bf16.msra.mxu1 %v1890_v29 }
  0x3d   :  { %376 = vmatprep.subr.bf16.mxu1 %v1896_v30 }
  0x3f   :  { %336 = vmatpush1.bf16.msra.mxu0 %v1902_v31 }
  0x40   :  { %428 = vmatprep.subr.bf16.mxu0 %v1723_v0  ;;  %377 = vmatpush1.bf16.msra.mxu1 %v1909_v32 }
  0x41   :  { %469 = vmatprep.subr.bf16.mxu1 %v1736_v3 }
  0xf5   :  { %v248_v35 = vpop.f32.mrb[0].mxu0  ;;  %v289_v41 = vpop.f32.mrb[0].mxu1 }
  0xf6   :  { %v296_v37 = vadd.f32 %v248_v35, %v50_v33  ;;  %v250_v38 = vpop.f32.mrb[1].mxu0  ;;  %v298_v42 = vadd.f32 %v289_v41, %v52_v36  ;;  %v291_v44 = vpop.f32.mrb[1].mxu1  ;;  %v1428_v35 = vld [vmem:[%s2569_s0 + $0x28] sm:$0xff] }
  0xf7   :  { %v297_v39 = vadd.f32 %v250_v38, %v51_v34  ;;  %v252_v40 = vpop.f32.mrb[2].mxu0  ;;  %v293_v45 = vpop.f32.mrb[2].mxu1  ;;  %v299_v48 = vadd.f32 %v291_v44, %v53_v47  ;;  %v1427_v34 = vld [vmem:[%s2569_s0 + $0x20] sm:$0xff] }
  0xf8   :  { %1560 = vtanh.f32 %v296_v37  ;;  %v253_v43 = vpop.f32.mrb[3].mxu0  ;;  %v294_v46 = vpop.f32.mrb[3].mxu1  ;;  %v1429_v37 = vld [vmem:[%s2569_s0 + $0x30] sm:$0xff] }
  0xf9   :  { %1562 = vtanh.f32 %v297_v39 }
  0xfa   :  { %1564 = vtanh.f32 %v298_v42 }
  0xfb   :  { %1566 = vtanh.f32 %v299_v48  ;;  %v1430_v48 = vld [vmem:[%s2569_s0 + $0x38] sm:$0xff] }
 0x102   :  { %v1561_v49 = vpop.eup %1560 }
 0x103   :  { %v1563_v50 = vpop.eup %1562  ;;  %v304_v51 = vmul.f32 0.5, %v1561_v49 }
 0x104   :  { %v1565_v52 = vpop.eup %1564  ;;  %v306_v53 = vmul.f32 0.5, %v1563_v50 }
 0x105   :  { %v305_v54 = vadd.f32 0.5, %v304_v51  ;;  %v1567_v59 = vpop.eup %1566 }
 0x106   :  { %v307_v55 = vadd.f32 0.5, %v306_v53  ;;  %v308_v60 = vmul.f32 0.5, %v1567_v59 }
 0x107   :  { %v311_v56 = vmul.f32 %v1565_v52, %v305_v54 }
 0x108   :  { %v310_v57 = vmul.f32 0.0, %v307_v55  ;;  %v309_v61 = vadd.f32 0.5, %v308_v60 }
 0x10a   :  { %v1964_v58 = vadd.f32 %v311_v56, %v310_v57 }
 0x10c   :  { %1568 = vtanh.f32 %v1964_v58 }
 0x116   :  { %v1569_v62 = vpop.eup %1568 }
 0x117   :  { %v314_v63 = vmul.f32 %v1569_v62, %v309_v61 }
 0x119   :  { %v320_v33 = vpack.c.bf16 %v314_v63, %v314_v63 }
 0x11b   :  { %354 = vmatmul.mubr.bf16.vlgmr.msra.gmra.mrb[4].mxu0 %v320_v33  ;;  %395 = vmatmul.mubr.bf16.vlgmr.msra.gmra.mrb[4].mxu1 %v320_v33 }
 0x11c   :  { %429 = vmatpush1.bf16.msra.mxu0 %v1730_v2  ;;  %470 = vmatpush1.bf16.msra.mxu1 %v1741_v4 }
 0x11d   :  { %430 = vmatprep.subr.bf16.mxu0 %v1747_v5  ;;  %471 = vmatprep.subr.bf16.mxu1 %v1758_v7 }
 0x11e   :  { %460 = vmatprep.mubr.bf16.mxu0 %v1692_v1  ;;  %501 = vmatprep.mubr.bf16.mxu1 %v1692_v1 }
 0x120   :  { %431 = vmatpush1.bf16.msra.mxu0 %v1752_v6  ;;  %472 = vmatpush1.bf16.msra.mxu1 %v1765_v8 }
 0x121   :  { %432 = vmatprep.subr.bf16.mxu0 %v1771_v9  ;;  %473 = vmatprep.subr.bf16.mxu1 %v1782_v11 }
 0x124   :  { %433 = vmatpush1.bf16.msra.mxu0 %v1777_v10  ;;  %474 = vmatpush1.bf16.msra.mxu1 %v1794_v13 }
 0x125   :  { %434 = vmatprep.subr.bf16.mxu0 %v1788_v12  ;;  %475 = vmatprep.subr.bf16.mxu1 %v1800_v14 }
 0x128   :  { %435 = vmatpush1.bf16.msra.mxu0 %v1806_v15  ;;  %476 = vmatpush1.bf16.msra.mxu1 %v1818_v17 }
 0x129   :  { %436 = vmatprep.subr.bf16.mxu0 %v1812_v16  ;;  %477 = vmatprep.subr.bf16.mxu1 %v1824_v18 }
 0x12c   :  { %437 = vmatpush1.bf16.msra.mxu0 %v1830_v19  ;;  %478 = vmatpush1.bf16.msra.mxu1 %v1842_v21 }
 0x12d   :  { %438 = vmatprep.subr.bf16.mxu0 %v1836_v20  ;;  %479 = vmatprep.subr.bf16.mxu1 %v1848_v22 }
 0x130   :  { %439 = vmatpush1.bf16.msra.mxu0 %v1854_v23  ;;  %480 = vmatpush1.bf16.msra.mxu1 %v1866_v25 }
 0x131   :  { %440 = vmatprep.subr.bf16.mxu0 %v1860_v24  ;;  %481 = vmatprep.subr.bf16.mxu1 %v1872_v26 }
 0x134   :  { %441 = vmatpush1.bf16.msra.mxu0 %v1878_v27  ;;  %482 = vmatpush1.bf16.msra.mxu1 %v1890_v29 }
 0x135   :  { %442 = vmatprep.subr.bf16.mxu0 %v1884_v28  ;;  %483 = vmatprep.subr.bf16.mxu1 %v1896_v30 }
 0x138   :  { %443 = vmatpush1.bf16.msra.mxu0 %v1902_v31  ;;  %484 = vmatpush1.bf16.msra.mxu1 %v1909_v32 }
 0x139   :  { %535 = vmatprep.subr.bf16.mxu0 %v1723_v0  ;;  %576 = vmatprep.subr.bf16.mxu1 %v1736_v3 }
 0x1ee   :  { %v355_v36 = vpop.f32.mrb[4].mxu0  ;;  %v396_v38 = vpop.f32.mrb[4].mxu1 }
 0x1ef   :  { %v403_v39 = vadd.f32 %v1427_v34, %v355_v36  ;;  %v357_v40 = vpop.f32.mrb[5].mxu0  ;;  %v398_v41 = vpop.f32.mrb[5].mxu1  ;;  %v405_v45 = vadd.f32 %v1429_v37, %v396_v38  ;;  %v1432_v36 = vld [vmem:[%s2569_s0 + $0x48] sm:$0xff]  ;;  %v1433_v38 = vld [vmem:[%s2569_s0 + $0x50] sm:$0xff] }
 0x1f0   :  { %v404_v42 = vadd.f32 %v1428_v35, %v357_v40  ;;  %v359_v43 = vpop.f32.mrb[6].mxu0  ;;  %v400_v44 = vpop.f32.mrb[6].mxu1  ;;  %v406_v49 = vadd.f32 %v1430_v48, %v398_v41 }
 0x1f1   :  { %1570 = vtanh.f32 %v403_v39  ;;  %v360_v46 = vpop.f32.mrb[7].mxu0  ;;  %v401_v47 = vpop.f32.mrb[7].mxu1 }
 0x1f2   :  { %1572 = vtanh.f32 %v404_v42 }
 0x1f3   :  { %1574 = vtanh.f32 %v405_v45 }
 0x1f4   :  { %1576 = vtanh.f32 %v406_v49  ;;  %v1434_v49 = vld [vmem:[%s2569_s0 + $0x58] sm:$0xff] }
 0x1fb   :  { %v1571_v50 = vpop.eup %1570 }
 0x1fc   :  { %v411_v51 = vmul.f32 0.5, %v1571_v50  ;;  %v1573_v52 = vpop.eup %1572 }
 0x1fd   :  { %v413_v54 = vmul.f32 0.5, %v1573_v52  ;;  %v1575_v55 = vpop.eup %1574 }
 0x1fe   :  { %v412_v53 = vadd.f32 0.5, %v411_v51  ;;  %v1577_v61 = vpop.eup %1576 }
 0x1ff   :  { %v414_v56 = vadd.f32 0.5, %v413_v54  ;;  %v415_v62 = vmul.f32 0.5, %v1577_v61 }
 0x200   :  { %v418_v57 = vmul.f32 %v1575_v55, %v412_v53 }
 0x201   :  { %v417_v59 = vmul.f32 %v414_v56, %v1964_v58  ;;  %v416_v63 = vadd.f32 0.5, %v415_v62  ;;  %v1431_v58 = vld [vmem:[%s2569_s0 + $0x40] sm:$0xff] }
 0x203   :  { %v2014_v60 = vadd.f32 %v418_v57, %v417_v59 }
 0x205   :  { %1578 = vtanh.f32 %v2014_v60 }
 0x20f   :  { %v1579_v33 = vpop.eup %1578 }
 0x210   :  { %v421_v34 = vmul.f32 %v1579_v33, %v416_v63 }
 0x212   :  { %v427_v35 = vpack.c.bf16 %v421_v34, %v421_v34 }
 0x214   :  { %461 = vmatmul.mubr.bf16.vlgmr.msra.gmra.mrb[8].mxu0 %v427_v35  ;;  %502 = vmatmul.mubr.bf16.vlgmr.msra.gmra.mrb[8].mxu1 %v427_v35 }
 0x215   :  { %536 = vmatpush1.bf16.msra.mxu0 %v1730_v2  ;;  %577 = vmatpush1.bf16.msra.mxu1 %v1741_v4 }
 0x216   :  { %537 = vmatprep.subr.bf16.mxu0 %v1747_v5  ;;  %578 = vmatprep.subr.bf16.mxu1 %v1758_v7 }
 0x217   :  { %567 = vmatprep.mubr.bf16.mxu0 %v1692_v1  ;;  %608 = vmatprep.mubr.bf16.mxu1 %v1692_v1 }
 0x219   :  { %538 = vmatpush1.bf16.msra.mxu0 %v1752_v6  ;;  %579 = vmatpush1.bf16.msra.mxu1 %v1765_v8 }
 0x21a   :  { %539 = vmatprep.subr.bf16.mxu0 %v1771_v9  ;;  %580 = vmatprep.subr.bf16.mxu1 %v1782_v11 }
 0x21d   :  { %540 = vmatpush1.bf16.msra.mxu0 %v1777_v10  ;;  %581 = vmatpush1.bf16.msra.mxu1 %v1794_v13 }
 0x21e   :  { %541 = vmatprep.subr.bf16.mxu0 %v1788_v12  ;;  %582 = vmatprep.subr.bf16.mxu1 %v1800_v14 }
 0x221   :  { %542 = vmatpush1.bf16.msra.mxu0 %v1806_v15  ;;  %583 = vmatpush1.bf16.msra.mxu1 %v1818_v17 }
 0x222   :  { %543 = vmatprep.subr.bf16.mxu0 %v1812_v16  ;;  %584 = vmatprep.subr.bf16.mxu1 %v1824_v18 }
 0x225   :  { %544 = vmatpush1.bf16.msra.mxu0 %v1830_v19  ;;  %585 = vmatpush1.bf16.msra.mxu1 %v1842_v21 }
 0x226   :  { %545 = vmatprep.subr.bf16.mxu0 %v1836_v20  ;;  %586 = vmatprep.subr.bf16.mxu1 %v1848_v22 }
 0x229   :  { %546 = vmatpush1.bf16.msra.mxu0 %v1854_v23  ;;  %587 = vmatpush1.bf16.msra.mxu1 %v1866_v25 }
 0x22a   :  { %547 = vmatprep.subr.bf16.mxu0 %v1860_v24  ;;  %588 = vmatprep.subr.bf16.mxu1 %v1872_v26 }
 0x22d   :  { %548 = vmatpush1.bf16.msra.mxu0 %v1878_v27  ;;  %589 = vmatpush1.bf16.msra.mxu1 %v1890_v29 }
 0x22e   :  { %549 = vmatprep.subr.bf16.mxu0 %v1884_v28  ;;  %590 = vmatprep.subr.bf16.mxu1 %v1896_v30 }
 0x231   :  { %550 = vmatpush1.bf16.msra.mxu0 %v1902_v31  ;;  %591 = vmatpush1.bf16.msra.mxu1 %v1909_v32 }
 0x232   :  { %642 = vmatprep.subr.bf16.mxu0 %v1723_v0  ;;  %683 = vmatprep.subr.bf16.mxu1 %v1736_v3 }
 0x2e7   :  { %v462_v37 = vpop.f32.mrb[8].mxu0  ;;  %v503_v39 = vpop.f32.mrb[8].mxu1 }
 0x2e8   :  { %v510_v40 = vadd.f32 %v1431_v58, %v462_v37  ;;  %v464_v41 = vpop.f32.mrb[9].mxu0  ;;  %v505_v42 = vpop.f32.mrb[9].mxu1  ;;  %v512_v46 = vadd.f32 %v1433_v38, %v503_v39  ;;  %v1436_v37 = vld [vmem:[%s2569_s0 + $0x68] sm:$0xff]  ;;  %v1437_v39 = vld [vmem:[%s2569_s0 + $0x70] sm:$0xff] }
 0x2e9   :  { %v511_v43 = vadd.f32 %v1432_v36, %v464_v41  ;;  %v466_v44 = vpop.f32.mrb[10].mxu0  ;;  %v507_v45 = vpop.f32.mrb[10].mxu1  ;;  %v513_v50 = vadd.f32 %v1434_v49, %v505_v42 }
 0x2ea   :  { %1580 = vtanh.f32 %v510_v40  ;;  %v467_v47 = vpop.f32.mrb[11].mxu0  ;;  %v508_v48 = vpop.f32.mrb[11].mxu1 }
 0x2eb   :  { %1582 = vtanh.f32 %v511_v43 }
 0x2ec   :  { %1584 = vtanh.f32 %v512_v46 }
 0x2ed   :  { %1586 = vtanh.f32 %v513_v50  ;;  %v1438_v50 = vld [vmem:[%s2569_s0 + $0x78] sm:$0xff] }
 0x2f4   :  { %v1581_v51 = vpop.eup %1580 }
 0x2f5   :  { %v518_v52 = vmul.f32 0.5, %v1581_v51  ;;  %v1583_v53 = vpop.eup %1582 }
 0x2f6   :  { %v520_v55 = vmul.f32 0.5, %v1583_v53  ;;  %v1585_v56 = vpop.eup %1584 }
 0x2f7   :  { %v519_v54 = vadd.f32 0.5, %v518_v52  ;;  %v1587_v63 = vpop.eup %1586 }
 0x2f8   :  { %v521_v57 = vadd.f32 0.5, %v520_v55  ;;  %v522_v33 = vmul.f32 0.5, %v1587_v63 }
 0x2f9   :  { %v525_v59 = vmul.f32 %v1585_v56, %v519_v54 }
 0x2fa   :  { %v524_v61 = vmul.f32 %v521_v57, %v2014_v60  ;;  %v523_v34 = vadd.f32 0.5, %v522_v33  ;;  %v1435_v60 = vld [vmem:[%s2569_s0 + $0x60] sm:$0xff] }
 0x2fc   :  { %v2064_v62 = vadd.f32 %v525_v59, %v524_v61 }
 0x2fe   :  { %1588 = vtanh.f32 %v2064_v62 }
 0x308   :  { %v1589_v35 = vpop.eup %1588 }
 0x309   :  { %v528_v58 = vmul.f32 %v1589_v35, %v523_v34 }
 0x30b   :  { %v534_v36 = vpack.c.bf16 %v528_v58, %v528_v58 }
 0x30d   :  { %568 = vmatmul.mubr.bf16.vlgmr.msra.gmra.mrb[12].mxu0 %v534_v36  ;;  %609 = vmatmul.mubr.bf16.vlgmr.msra.gmra.mrb[12].mxu1 %v534_v36 }
 0x30e   :  { %643 = vmatpush1.bf16.msra.mxu0 %v1730_v2  ;;  %684 = vmatpush1.bf16.msra.mxu1 %v1741_v4 }
 0x30f   :  { %644 = vmatprep.subr.bf16.mxu0 %v1747_v5  ;;  %685 = vmatprep.subr.bf16.mxu1 %v1758_v7 }
 0x310   :  { %674 = vmatprep.mubr.bf16.mxu0 %v1692_v1  ;;  %715 = vmatprep.mubr.bf16.mxu1 %v1692_v1 }
 0x312   :  { %645 = vmatpush1.bf16.msra.mxu0 %v1752_v6  ;;  %686 = vmatpush1.bf16.msra.mxu1 %v1765_v8 }
 0x313   :  { %646 = vmatprep.subr.bf16.mxu0 %v1771_v9  ;;  %687 = vmatprep.subr.bf16.mxu1 %v1782_v11 }
 0x316   :  { %647 = vmatpush1.bf16.msra.mxu0 %v1777_v10  ;;  %688 = vmatpush1.bf16.msra.mxu1 %v1794_v13 }
 0x317   :  { %648 = vmatprep.subr.bf16.mxu0 %v1788_v12  ;;  %689 = vmatprep.subr.bf16.mxu1 %v1800_v14 }
 0x31a   :  { %649 = vmatpush1.bf16.msra.mxu0 %v1806_v15  ;;  %690 = vmatpush1.bf16.msra.mxu1 %v1818_v17 }
 0x31b   :  { %650 = vmatprep.subr.bf16.mxu0 %v1812_v16  ;;  %691 = vmatprep.subr.bf16.mxu1 %v1824_v18 }
 0x31e   :  { %651 = vmatpush1.bf16.msra.mxu0 %v1830_v19  ;;  %692 = vmatpush1.bf16.msra.mxu1 %v1842_v21 }
 0x31f   :  { %652 = vmatprep.subr.bf16.mxu0 %v1836_v20  ;;  %693 = vmatprep.subr.bf16.mxu1 %v1848_v22 }
 0x322   :  { %653 = vmatpush1.bf16.msra.mxu0 %v1854_v23  ;;  %694 = vmatpush1.bf16.msra.mxu1 %v1866_v25 }
 0x323   :  { %654 = vmatprep.subr.bf16.mxu0 %v1860_v24  ;;  %695 = vmatprep.subr.bf16.mxu1 %v1872_v26 }
 0x326   :  { %655 = vmatpush1.bf16.msra.mxu0 %v1878_v27  ;;  %696 = vmatpush1.bf16.msra.mxu1 %v1890_v29 }
 0x327   :  { %656 = vmatprep.subr.bf16.mxu0 %v1884_v28  ;;  %697 = vmatprep.subr.bf16.mxu1 %v1896_v30 }
 0x32a   :  { %657 = vmatpush1.bf16.msra.mxu0 %v1902_v31  ;;  %698 = vmatpush1.bf16.msra.mxu1 %v1909_v32 }
 0x32b   :  { %749 = vmatprep.subr.bf16.mxu0 %v1723_v0  ;;  %790 = vmatprep.subr.bf16.mxu1 %v1736_v3 }
 0x3e0   :  { %v569_v38 = vpop.f32.mrb[12].mxu0  ;;  %v610_v40 = vpop.f32.mrb[12].mxu1 }
 0x3e1   :  { %v617_v41 = vadd.f32 %v1435_v60, %v569_v38  ;;  %v571_v42 = vpop.f32.mrb[13].mxu0  ;;  %v612_v43 = vpop.f32.mrb[13].mxu1  ;;  %v619_v47 = vadd.f32 %v1437_v39, %v610_v40  ;;  %v1440_v38 = vld [vmem:[%s2569_s0 + $0x88] sm:$0xff]  ;;  %v1441_v40 = vld [vmem:[%s2569_s0 + $0x90] sm:$0xff] }
 0x3e2   :  { %v618_v44 = vadd.f32 %v1436_v37, %v571_v42  ;;  %v573_v45 = vpop.f32.mrb[14].mxu0  ;;  %v614_v46 = vpop.f32.mrb[14].mxu1  ;;  %v620_v51 = vadd.f32 %v1438_v50, %v612_v43 }
 0x3e3   :  { %1590 = vtanh.f32 %v617_v41  ;;  %v574_v48 = vpop.f32.mrb[15].mxu0  ;;  %v615_v49 = vpop.f32.mrb[15].mxu1 }
 0x3e4   :  { %1592 = vtanh.f32 %v618_v44 }
 0x3e5   :  { %1594 = vtanh.f32 %v619_v47 }
 0x3e6   :  { %1596 = vtanh.f32 %v620_v51  ;;  %v1442_v51 = vld [vmem:[%s2569_s0 + $0x98] sm:$0xff] }
 0x3ed   :  { %v1591_v52 = vpop.eup %1590 }
 0x3ee   :  { %v625_v53 = vmul.f32 0.5, %v1591_v52  ;;  %v1593_v54 = vpop.eup %1592 }
 0x3ef   :  { %v627_v56 = vmul.f32 0.5, %v1593_v54  ;;  %v1595_v57 = vpop.eup %1594 }
 0x3f0   :  { %v626_v55 = vadd.f32 0.5, %v625_v53  ;;  %v1597_v34 = vpop.eup %1596 }
 0x3f1   :  { %v628_v59 = vadd.f32 0.5, %v627_v56  ;;  %v629_v35 = vmul.f32 0.5, %v1597_v34 }
 0x3f2   :  { %v632_v61 = vmul.f32 %v1595_v57, %v626_v55 }
 0x3f3   :  { %v631_v63 = vmul.f32 %v628_v59, %v2064_v62  ;;  %v630_v58 = vadd.f32 0.5, %v629_v35  ;;  %v1439_v62 = vld [vmem:[%s2569_s0 + $0x80] sm:$0xff] }
 0x3f5   :  { %v2114_v33 = vadd.f32 %v632_v61, %v631_v63 }
 0x3f7   :  { %1598 = vtanh.f32 %v2114_v33 }
 0x401   :  { %v1599_v36 = vpop.eup %1598 }
 0x402   :  { %v635_v60 = vmul.f32 %v1599_v36, %v630_v58 }
 0x404   :  { %v641_v37 = vpack.c.bf16 %v635_v60, %v635_v60 }
 0x406   :  { %675 = vmatmul.mubr.bf16.vlgmr.msra.gmra.mrb[16].mxu0 %v641_v37  ;;  %716 = vmatmul.mubr.bf16.vlgmr.msra.gmra.mrb[16].mxu1 %v641_v37 }
 0x407   :  { %750 = vmatpush1.bf16.msra.mxu0 %v1730_v2  ;;  %791 = vmatpush1.bf16.msra.mxu1 %v1741_v4 }
 0x408   :  { %751 = vmatprep.subr.bf16.mxu0 %v1747_v5  ;;  %792 = vmatprep.subr.bf16.mxu1 %v1758_v7 }
 0x409   :  { %781 = vmatprep.mubr.bf16.mxu0 %v1692_v1  ;;  %822 = vmatprep.mubr.bf16.mxu1 %v1692_v1 }
 0x40b   :  { %752 = vmatpush1.bf16.msra.mxu0 %v1752_v6  ;;  %793 = vmatpush1.bf16.msra.mxu1 %v1765_v8 }
 0x40c   :  { %753 = vmatprep.subr.bf16.mxu0 %v1771_v9  ;;  %794 = vmatprep.subr.bf16.mxu1 %v1782_v11 }
 0x40f   :  { %754 = vmatpush1.bf16.msra.mxu0 %v1777_v10  ;;  %795 = vmatpush1.bf16.msra.mxu1 %v1794_v13 }
 0x410   :  { %755 = vmatprep.subr.bf16.mxu0 %v1788_v12  ;;  %796 = vmatprep.subr.bf16.mxu1 %v1800_v14 }
 0x413   :  { %756 = vmatpush1.bf16.msra.mxu0 %v1806_v15  ;;  %797 = vmatpush1.bf16.msra.mxu1 %v1818_v17 }
 0x414   :  { %757 = vmatprep.subr.bf16.mxu0 %v1812_v16  ;;  %798 = vmatprep.subr.bf16.mxu1 %v1824_v18 }
 0x417   :  { %758 = vmatpush1.bf16.msra.mxu0 %v1830_v19  ;;  %799 = vmatpush1.bf16.msra.mxu1 %v1842_v21 }
 0x418   :  { %759 = vmatprep.subr.bf16.mxu0 %v1836_v20  ;;  %800 = vmatprep.subr.bf16.mxu1 %v1848_v22 }
 0x41b   :  { %760 = vmatpush1.bf16.msra.mxu0 %v1854_v23  ;;  %801 = vmatpush1.bf16.msra.mxu1 %v1866_v25 }
 0x41c   :  { %761 = vmatprep.subr.bf16.mxu0 %v1860_v24  ;;  %802 = vmatprep.subr.bf16.mxu1 %v1872_v26 }
 0x41f   :  { %762 = vmatpush1.bf16.msra.mxu0 %v1878_v27  ;;  %803 = vmatpush1.bf16.msra.mxu1 %v1890_v29 }
 0x420   :  { %763 = vmatprep.subr.bf16.mxu0 %v1884_v28  ;;  %804 = vmatprep.subr.bf16.mxu1 %v1896_v30 }
 0x423   :  { %764 = vmatpush1.bf16.msra.mxu0 %v1902_v31  ;;  %805 = vmatpush1.bf16.msra.mxu1 %v1909_v32 }
 0x424   :  { %856 = vmatprep.subr.bf16.mxu0 %v1723_v0  ;;  %897 = vmatprep.subr.bf16.mxu1 %v1736_v3 }
 0x4d9   :  { %v676_v39 = vpop.f32.mrb[16].mxu0  ;;  %v717_v41 = vpop.f32.mrb[16].mxu1 }
 0x4da   :  { %v724_v42 = vadd.f32 %v1439_v62, %v676_v39  ;;  %v678_v43 = vpop.f32.mrb[17].mxu0  ;;  %v719_v44 = vpop.f32.mrb[17].mxu1  ;;  %v726_v48 = vadd.f32 %v1441_v40, %v717_v41 }
 0x4db   :  { %v725_v45 = vadd.f32 %v1440_v38, %v678_v43  ;;  %v680_v46 = vpop.f32.mrb[18].mxu0  ;;  %v721_v47 = vpop.f32.mrb[18].mxu1  ;;  %v727_v52 = vadd.f32 %v1442_v51, %v719_v44 }
 0x4dc   :  { %1600 = vtanh.f32 %v724_v42  ;;  %v681_v49 = vpop.f32.mrb[19].mxu0  ;;  %v722_v50 = vpop.f32.mrb[19].mxu1 }
 0x4dd   :  { %1602 = vtanh.f32 %v725_v45 }
 0x4de   :  { %1604 = vtanh.f32 %v726_v48 }
 0x4df   :  { %1606 = vtanh.f32 %v727_v52 }
 0x4e6   :  { %v1601_v53 = vpop.eup %1600 }
 0x4e7   :  { %v732_v54 = vmul.f32 0.5, %v1601_v53  ;;  %v1603_v55 = vpop.eup %1602 }
 0x4e8   :  { %v734_v57 = vmul.f32 0.5, %v1603_v55  ;;  %v1605_v59 = vpop.eup %1604 }
 0x4e9   :  { %v733_v56 = vadd.f32 0.5, %v732_v54  ;;  %v1607_v58 = vpop.eup %1606 }
 0x4ea   :  { %v735_v61 = vadd.f32 0.5, %v734_v57  ;;  %v736_v36 = vmul.f32 0.5, %v1607_v58  ;;  %v2226_v57 = vld [vmem:[%s2568_s1 + $0x8] ss:$16 sps:$4 sm:$0xff]   ;;  %v2264_v58 = vld [vmem:[%s2568_s1 + $0x4c] ss:$16 sps:$4 sm:$0xff]  }
 0x4eb   :  { %v739_v63 = vmul.f32 %v1605_v59, %v733_v56  ;;  %v2220_v56 = vld [vmem:[%s2568_s1] ss:$16 sps:$4 sm:$0xff]   ;;  %v2232_v59 = vld [vmem:[%s2568_s1 + $0x24] ss:$16 sps:$4 sm:$0xff]  }
 0x4ec   :  { %v738_v34 = vmul.f32 %v735_v61, %v2114_v33  ;;  %v737_v60 = vadd.f32 0.5, %v736_v36  ;;  %v1446_v33 = vld [vmem:[%s2569_s0 + $0xb8] sm:$0xff]  ;;  %v2270_v36 = vld [vmem:[%s2568_s1 + $0x40] ss:$16 sps:$4 sm:$0xff]  }
 0x4ed   :  { %v2238_v61 = vld [vmem:[%s2568_s1 + $0x2c] ss:$16 sps:$4 sm:$0xff]  }
 0x4ee   :  { %v2164_v35 = vadd.f32 %v739_v63, %v738_v34  ;;  %v2246_v63 = vld [vmem:[%s2568_s1 + $0x20] ss:$16 sps:$4 sm:$0xff]   ;;  %v2252_v34 = vld [vmem:[%s2568_s1 + $0x28] ss:$16 sps:$4 sm:$0xff]  }
 0x4f0   :  { %1608 = vtanh.f32 %v2164_v35 }
 0x4fa   :  { %v1609_v37 = vpop.eup %1608 }
 0x4fb   :  { %v742_v62 = vmul.f32 %v1609_v37, %v737_v60  ;;  %v2276_v60 = vld [vmem:[%s2568_s1 + $0x48] ss:$16 sps:$4 sm:$0xff]   ;;  %v2282_v37 = vld [vmem:[%s2568_s1 + $0x64] ss:$16 sps:$4 sm:$0xff]  }
 0x4fd   :  { %v748_v38 = vpack.c.bf16 %v742_v62, %v742_v62  ;;  %v2288_v62 = vld [vmem:[%s2568_s1 + $0x6c] ss:$16 sps:$4 sm:$0xff]  }
 0x4ff   :  { %782 = vmatmul.mubr.bf16.vlgmr.msra.gmra.mrb[20].mxu0 %v748_v38  ;;  %823 = vmatmul.mubr.bf16.vlgmr.msra.gmra.mrb[20].mxu1 %v748_v38 }
 0x500   :  { %857 = vmatpush1.bf16.msra.mxu0 %v1730_v2  ;;  %898 = vmatpush1.bf16.msra.mxu1 %v1741_v4  ;;  %v1443_v2 = vld [vmem:[%s2569_s0 + $0xa0] sm:$0xff]  ;;  %v1444_v4 = vld [vmem:[%s2569_s0 + $0xa8] sm:$0xff] }
 0x501   :  { %858 = vmatprep.subr.bf16.mxu0 %v1747_v5  ;;  %899 = vmatprep.subr.bf16.mxu1 %v1758_v7 }
 0x502   :  { %888 = vmatprep.mubr.bf16.mxu0 %v1692_v1  ;;  %929 = vmatprep.mubr.bf16.mxu1 %v1692_v1 }
 0x504   :  { %859 = vmatpush1.bf16.msra.mxu0 %v1752_v6  ;;  %900 = vmatpush1.bf16.msra.mxu1 %v1765_v8  ;;  %v1445_v6 = vld [vmem:[%s2569_s0 + $0xb0] sm:$0xff] }
 0x505   :  { %860 = vmatprep.subr.bf16.mxu0 %v1771_v9  ;;  %901 = vmatprep.subr.bf16.mxu1 %v1782_v11 }
 0x508   :  { %861 = vmatpush1.bf16.msra.mxu0 %v1777_v10  ;;  %902 = vmatpush1.bf16.msra.mxu1 %v1794_v13 }
 0x509   :  { %862 = vmatprep.subr.bf16.mxu0 %v1788_v12  ;;  %903 = vmatprep.subr.bf16.mxu1 %v1800_v14 }
 0x50c   :  { %863 = vmatpush1.bf16.msra.mxu0 %v1806_v15  ;;  %904 = vmatpush1.bf16.msra.mxu1 %v1818_v17 }
 0x50d   :  { %864 = vmatprep.subr.bf16.mxu0 %v1812_v16  ;;  %905 = vmatprep.subr.bf16.mxu1 %v1824_v18 }
 0x510   :  { %865 = vmatpush1.bf16.msra.mxu0 %v1830_v19  ;;  %906 = vmatpush1.bf16.msra.mxu1 %v1842_v21 }
 0x511   :  { %866 = vmatprep.subr.bf16.mxu0 %v1836_v20  ;;  %907 = vmatprep.subr.bf16.mxu1 %v1848_v22 }
 0x514   :  { %867 = vmatpush1.bf16.msra.mxu0 %v1854_v23  ;;  %908 = vmatpush1.bf16.msra.mxu1 %v1866_v25 }
 0x515   :  { %868 = vmatprep.subr.bf16.mxu0 %v1860_v24  ;;  %909 = vmatprep.subr.bf16.mxu1 %v1872_v26 }
 0x518   :  { %869 = vmatpush1.bf16.msra.mxu0 %v1878_v27  ;;  %910 = vmatpush1.bf16.msra.mxu1 %v1890_v29 }
 0x519   :  { %870 = vmatprep.subr.bf16.mxu0 %v1884_v28  ;;  %911 = vmatprep.subr.bf16.mxu1 %v1896_v30 }
 0x51c   :  { %871 = vmatpush1.bf16.msra.mxu0 %v1902_v31  ;;  %912 = vmatpush1.bf16.msra.mxu1 %v1909_v32 }
 0x51d   :  { %963 = vmatprep.subr.bf16.mxu0 %v1723_v0  ;;  %1004 = vmatprep.subr.bf16.mxu1 %v1736_v3 }
 0x5d2   :  { %v783_v5 = vpop.f32.mrb[20].mxu0  ;;  %v824_v7 = vpop.f32.mrb[20].mxu1 }
 0x5d3   :  { %v831_v8 = vadd.f32 %v1443_v2, %v783_v5  ;;  %v785_v9 = vpop.f32.mrb[21].mxu0  ;;  %v826_v10 = vpop.f32.mrb[21].mxu1  ;;  %v833_v12 = vadd.f32 %v1445_v6, %v824_v7 }
 0x5d4   :  { %v832_v0 = vadd.f32 %v1444_v4, %v785_v9  ;;  %v787_v11 = vpop.f32.mrb[22].mxu0  ;;  %v828_v3 = vpop.f32.mrb[22].mxu1  ;;  %v834_v39 = vadd.f32 %v1446_v33, %v826_v10 }
 0x5d5   :  { %1610 = vtanh.f32 %v831_v8  ;;  %v788_v13 = vpop.f32.mrb[23].mxu0  ;;  %v829_v14 = vpop.f32.mrb[23].mxu1 }
 0x5d6   :  { %1612 = vtanh.f32 %v832_v0 }
 0x5d7   :  { %1614 = vtanh.f32 %v833_v12 }
 0x5d8   :  { %1616 = vtanh.f32 %v834_v39  ;;  %v2354_v39 = vld [vmem:[%s2568_s1 + $0x60] ss:$16 sps:$4 sm:$0xff]  }
 0x5df   :  { %v1611_v40 = vpop.eup %1610 }
 0x5e0   :  { %v839_v41 = vmul.f32 0.5, %v1611_v40  ;;  %v1613_v42 = vpop.eup %1612  ;;  %v2360_v40 = vld [vmem:[%s2568_s1 + $0x68] ss:$16 sps:$4 sm:$0xff]  }
 0x5e1   :  { %v841_v44 = vmul.f32 0.5, %v1613_v42  ;;  %v1615_v45 = vpop.eup %1614  ;;  %v2372_v42 = vld [vmem:[%s2568_s1 + $0x8c] ss:$16 sps:$4 sm:$0xff]  }
 0x5e2   :  { %v840_v43 = vadd.f32 0.5, %v839_v41  ;;  %v1617_v50 = vpop.eup %1616  ;;  %v2366_v41 = vld [vmem:[%s2568_s1 + $0x84] ss:$16 sps:$4 sm:$0xff]  }
 0x5e3   :  { %v842_v46 = vadd.f32 0.5, %v841_v44  ;;  %v843_v51 = vmul.f32 0.5, %v1617_v50  ;;  %v2384_v44 = vld [vmem:[%s2568_s1 + $0x88] ss:$16 sps:$4 sm:$0xff]   ;;  %v2420_v50 = vld [vmem:[%s2568_s1 + $0xcc] ss:$16 sps:$4 sm:$0xff]  }
 0x5e4   :  { %v846_v47 = vmul.f32 %v1615_v45, %v840_v43  ;;  %v2378_v43 = vld [vmem:[%s2568_s1 + $0x80] ss:$16 sps:$4 sm:$0xff]   ;;  %v2390_v45 = vld [vmem:[%s2568_s1 + $0xa4] ss:$16 sps:$4 sm:$0xff]  }
 0x5e5   :  { %v845_v48 = vmul.f32 %v842_v46, %v2164_v35  ;;  %v844_v52 = vadd.f32 0.5, %v843_v51  ;;  %v2258_v35 = vld [vmem:[%s2568_s1 + $0x44] ss:$16 sps:$4 sm:$0xff]   ;;  %v2396_v46 = vld [vmem:[%s2568_s1 + $0xac] ss:$16 sps:$4 sm:$0xff]  }
 0x5e6   :  { %v2426_v51 = vld [vmem:[%s2568_s1 + $0xc0] ss:$16 sps:$4 sm:$0xff]  }
 0x5e7   :  { %v2214_v49 = vadd.f32 %v846_v47, %v845_v48  ;;  %v2402_v47 = vld [vmem:[%s2568_s1 + $0xa0] ss:$16 sps:$4 sm:$0xff]   ;;  %v2408_v48 = vld [vmem:[%s2568_s1 + $0xa8] ss:$16 sps:$4 sm:$0xff]  }
 0x5e9   :  { %1618 = vtanh.f32 %v2214_v49 }
 0x5f3   :  { %v1619_v53 = vpop.eup %1618 }
 0x5f4   :  { %v849_v54 = vmul.f32 %v1619_v53, %v844_v52  ;;  %v2432_v52 = vld [vmem:[%s2568_s1 + $0xc8] ss:$16 sps:$4 sm:$0xff]   ;;  %v2438_v53 = vld [vmem:[%s2568_s1 + $0xe4] ss:$16 sps:$4 sm:$0xff]  }
 0x5f6   :  { %v855_v55 = vpack.c.bf16 %v849_v54, %v849_v54  ;;  %v2444_v54 = vld [vmem:[%s2568_s1 + $0xec] ss:$16 sps:$4 sm:$0xff]  }
 0x5f8   :  { %889 = vmatmul.mubr.bf16.vlgmr.msra.gmra.mrb[24].mxu0 %v855_v55  ;;  %930 = vmatmul.mubr.bf16.vlgmr.msra.gmra.mrb[24].mxu1 %v855_v55  ;;  %v2450_v55 = vld [vmem:[%s2568_s1 + $0xe0] ss:$16 sps:$4 sm:$0xff]  }
 0x5f9   :  { %964 = vmatpush1.bf16.msra.mxu0 %v2220_v56  ;;  %1005 = vmatpush1.bf16.msra.mxu1 %v2226_v57 }
 0x5fa   :  { %965 = vmatprep.subr.bf16.mxu0 %v2232_v59  ;;  %1006 = vmatprep.subr.bf16.mxu1 %v2238_v61 }
 0x5fb   :  { %995 = vmatprep.mubr.bf16.mxu0 %v1692_v1  ;;  %1036 = vmatprep.mubr.bf16.mxu1 %v1692_v1 }
 0x5fd   :  { %966 = vmatpush1.bf16.msra.mxu0 %v2246_v63  ;;  %1007 = vmatpush1.bf16.msra.mxu1 %v2252_v34 }
 0x5fe   :  { %967 = vmatprep.subr.bf16.mxu0 %v2258_v35  ;;  %1008 = vmatprep.subr.bf16.mxu1 %v2264_v58 }
 0x601   :  { %968 = vmatpush1.bf16.msra.mxu0 %v2270_v36  ;;  %1009 = vmatpush1.bf16.msra.mxu1 %v2276_v60 }
 0x602   :  { %969 = vmatprep.subr.bf16.mxu0 %v2282_v37  ;;  %1010 = vmatprep.subr.bf16.mxu1 %v2288_v62 }
 0x605   :  { %970 = vmatpush1.bf16.msra.mxu0 %v1806_v15  ;;  %1011 = vmatpush1.bf16.msra.mxu1 %v1818_v17  ;;  %v2312_v15 = vld [vmem:[%s2568_s1 + $0x4] ss:$16 sps:$4 sm:$0xff]  }
 0x606   :  { %971 = vmatprep.subr.bf16.mxu0 %v1812_v16  ;;  %1012 = vmatprep.subr.bf16.mxu1 %v1824_v18  ;;  %v2318_v16 = vld [vmem:[%s2568_s1 + $0xc] ss:$16 sps:$4 sm:$0xff]   ;;  %v1447_v17 = vld [vmem:[%s2569_s0 + $0xc0] sm:$0xff] }
 0x607   :  { %v1448_v18 = vld [vmem:[%s2569_s0 + $0xc8] sm:$0xff] }
 0x609   :  { %972 = vmatpush1.bf16.msra.mxu0 %v1830_v19  ;;  %1013 = vmatpush1.bf16.msra.mxu1 %v1842_v21 }
 0x60a   :  { %973 = vmatprep.subr.bf16.mxu0 %v1836_v20  ;;  %1014 = vmatprep.subr.bf16.mxu1 %v1848_v22  ;;  %v1449_v20 = vld [vmem:[%s2569_s0 + $0xd0] sm:$0xff] }
 0x60d   :  { %974 = vmatpush1.bf16.msra.mxu0 %v1854_v23  ;;  %1015 = vmatpush1.bf16.msra.mxu1 %v1866_v25 }
 0x60e   :  { %975 = vmatprep.subr.bf16.mxu0 %v1860_v24  ;;  %1016 = vmatprep.subr.bf16.mxu1 %v1872_v26 }
 0x611   :  { %976 = vmatpush1.bf16.msra.mxu0 %v1878_v27  ;;  %1017 = vmatpush1.bf16.msra.mxu1 %v1890_v29 }
 0x612   :  { %977 = vmatprep.subr.bf16.mxu0 %v1884_v28  ;;  %1018 = vmatprep.subr.bf16.mxu1 %v1896_v30 }
 0x615   :  { %978 = vmatpush1.bf16.msra.mxu0 %v1902_v31  ;;  %1019 = vmatpush1.bf16.msra.mxu1 %v1909_v32  ;;  %v1450_v31 = vld [vmem:[%s2569_s0 + $0xd8] sm:$0xff] }
 0x616   :  { %1070 = vmatprep.subr.bf16.mxu0 %v2312_v15  ;;  %1111 = vmatprep.subr.bf16.mxu1 %v2318_v16 }
 0x6cb   :  { %v890_v19 = vpop.f32.mrb[24].mxu0  ;;  %v931_v21 = vpop.f32.mrb[24].mxu1 }
 0x6cc   :  { %v938_v22 = vadd.f32 %v1447_v17, %v890_v19  ;;  %v892_v23 = vpop.f32.mrb[25].mxu0  ;;  %v933_v24 = vpop.f32.mrb[25].mxu1  ;;  %v940_v28 = vadd.f32 %v1449_v20, %v931_v21  ;;  %v2456_v17 = vld [vmem:[%s2568_s1 + $0xe8] ss:$16 sps:$4 sm:$0xff]   ;;  %v1453_v21 = vld [vmem:[%s2569_s0 + $0xf0] sm:$0xff] }
 0x6cd   :  { %v939_v25 = vadd.f32 %v1448_v18, %v892_v23  ;;  %v894_v26 = vpop.f32.mrb[26].mxu0  ;;  %v935_v27 = vpop.f32.mrb[26].mxu1  ;;  %v941_v32 = vadd.f32 %v1450_v31, %v933_v24  ;;  %v1451_v18 = vld [vmem:[%s2569_s0 + $0xe0] sm:$0xff]  ;;  %v1452_v19 = vld [vmem:[%s2569_s0 + $0xe8] sm:$0xff] }
 0x6ce   :  { %1620 = vtanh.f32 %v938_v22  ;;  %v895_v29 = vpop.f32.mrb[27].mxu0  ;;  %v936_v30 = vpop.f32.mrb[27].mxu1 }
 0x6cf   :  { %1622 = vtanh.f32 %v939_v25  ;;  %v1454_v30 = vld [vmem:[%s2569_s0 + $0xf8] sm:$0xff] }
 0x6d0   :  { %1624 = vtanh.f32 %v940_v28 }
 0x6d1   :  { %1626 = vtanh.f32 %v941_v32 }
 0x6d8   :  { %v1621_v38 = vpop.eup %1620 }
 0x6d9   :  { %v946_v2 = vmul.f32 0.5, %v1621_v38  ;;  %v1623_v4 = vpop.eup %1622 }
 0x6da   :  { %v948_v6 = vmul.f32 0.5, %v1623_v4  ;;  %v1625_v7 = vpop.eup %1624 }
 0x6db   :  { %v947_v5 = vadd.f32 0.5, %v946_v2  ;;  %v1627_v11 = vpop.eup %1626 }
 0x6dc   :  { %v949_v8 = vadd.f32 0.5, %v948_v6  ;;  %v950_v3 = vmul.f32 0.5, %v1627_v11 }
 0x6dd   :  { %v953_v9 = vmul.f32 %v1625_v7, %v947_v5 }
 0x6de   :  { %v952_v10 = vmul.f32 %v949_v8, %v2214_v49  ;;  %v951_v12 = vadd.f32 0.5, %v950_v3  ;;  %v2414_v49 = vld [vmem:[%s2568_s1 + $0xc4] ss:$16 sps:$4 sm:$0xff]  }
 0x6e0   :  { %v2334_v0 = vadd.f32 %v953_v9, %v952_v10 }
 0x6e2   :  { %1628 = vtanh.f32 %v2334_v0 }
 0x6ec   :  { %v1629_v13 = vpop.eup %1628 }
 0x6ed   :  { %v956_v14 = vmul.f32 %v1629_v13, %v951_v12 }
 0x6ef   :  { %v962_v33 = vpack.c.bf16 %v956_v14, %v956_v14 }
 0x6f1   :  { %996 = vmatmul.mubr.bf16.vlgmr.msra.gmra.mrb[28].mxu0 %v962_v33  ;;  %1037 = vmatmul.mubr.bf16.vlgmr.msra.gmra.mrb[28].mxu1 %v962_v33 }
 0x6f2   :  { %1071 = vmatpush1.bf16.msra.mxu0 %v2220_v56  ;;  %1112 = vmatpush1.bf16.msra.mxu1 %v2226_v57 }
 0x6f3   :  { %1072 = vmatprep.subr.bf16.mxu0 %v2232_v59  ;;  %1113 = vmatprep.subr.bf16.mxu1 %v2238_v61 }
 0x6f4   :  { %1102 = vmatprep.mubr.bf16.mxu0 %v1692_v1  ;;  %1143 = vmatprep.mubr.bf16.mxu1 %v1692_v1 }
 0x6f6   :  { %1073 = vmatpush1.bf16.msra.mxu0 %v2246_v63  ;;  %1114 = vmatpush1.bf16.msra.mxu1 %v2252_v34 }
 0x6f7   :  { %1074 = vmatprep.subr.bf16.mxu0 %v2258_v35  ;;  %1115 = vmatprep.subr.bf16.mxu1 %v2264_v58 }
 0x6fa   :  { %1075 = vmatpush1.bf16.msra.mxu0 %v2270_v36  ;;  %1116 = vmatpush1.bf16.msra.mxu1 %v2276_v60 }
 0x6fb   :  { %1076 = vmatprep.subr.bf16.mxu0 %v2282_v37  ;;  %1117 = vmatprep.subr.bf16.mxu1 %v2288_v62 }
 0x6fe   :  { %1077 = vmatpush1.bf16.msra.mxu0 %v2354_v39  ;;  %1118 = vmatpush1.bf16.msra.mxu1 %v2360_v40 }
 0x6ff   :  { %1078 = vmatprep.subr.bf16.mxu0 %v2366_v41  ;;  %1119 = vmatprep.subr.bf16.mxu1 %v2372_v42 }
 0x702   :  { %1079 = vmatpush1.bf16.msra.mxu0 %v2378_v43  ;;  %1120 = vmatpush1.bf16.msra.mxu1 %v2384_v44 }
 0x703   :  { %1080 = vmatprep.subr.bf16.mxu0 %v2390_v45  ;;  %1121 = vmatprep.subr.bf16.mxu1 %v2396_v46 }
 0x706   :  { %1081 = vmatpush1.bf16.msra.mxu0 %v2402_v47  ;;  %1122 = vmatpush1.bf16.msra.mxu1 %v2408_v48 }
 0x707   :  { %1082 = vmatprep.subr.bf16.mxu0 %v2414_v49  ;;  %1123 = vmatprep.subr.bf16.mxu1 %v2420_v50 }
 0x70a   :  { %1083 = vmatpush1.bf16.msra.mxu0 %v2426_v51  ;;  %1124 = vmatpush1.bf16.msra.mxu1 %v2432_v52 }
 0x70b   :  { %1084 = vmatprep.subr.bf16.mxu0 %v2438_v53  ;;  %1125 = vmatprep.subr.bf16.mxu1 %v2444_v54 }
 0x70e   :  { %1085 = vmatpush1.bf16.msra.mxu0 %v2450_v55  ;;  %1126 = vmatpush1.bf16.msra.mxu1 %v2456_v17 }
 0x70f   :  { %1177 = vmatprep.subr.bf16.mxu0 %v2312_v15  ;;  %1218 = vmatprep.subr.bf16.mxu1 %v2318_v16 }
 0x7c4   :  { %v997_v20 = vpop.f32.mrb[28].mxu0  ;;  %v1038_v22 = vpop.f32.mrb[28].mxu1 }
 0x7c5   :  { %v1045_v23 = vadd.f32 %v1451_v18, %v997_v20  ;;  %v999_v24 = vpop.f32.mrb[29].mxu0  ;;  %v1040_v25 = vpop.f32.mrb[29].mxu1  ;;  %v1047_v27 = vadd.f32 %v1453_v21, %v1038_v22  ;;  %v1552_v18 = vld [vmem:[%s2570_s2] sm:$0xff]   ;;  %v1553_v20 = vld [vmem:[%s2570_s2 + $0x8] sm:$0xff]   ;;  %v1554_v21 = vld [vmem:[%s2570_s2 + $0x10] sm:$0xff]  }
 0x7c6   :  { %v1046_v15 = vadd.f32 %v1452_v19, %v999_v24  ;;  %v1001_v26 = vpop.f32.mrb[30].mxu0  ;;  %v1042_v16 = vpop.f32.mrb[30].mxu1  ;;  %v1048_v31 = vadd.f32 %v1454_v30, %v1040_v25  ;;  %v1693_v19 = vmov 0.0   ;;  %v1555_v22 = vld [vmem:[%s2570_s2 + $0x18] sm:$0xff]   ;;  %v1557_v24 = vld [vmem:[%s2570_s2 + $0x28] sm:$0xff]   ;;  %v1558_v25 = vld [vmem:[%s2570_s2 + $0x30] sm:$0xff]  }
 0x7c7   :  { %1630 = vtanh.f32 %v1045_v23  ;;  %v1002_v28 = vpop.f32.mrb[31].mxu0  ;;  %v1043_v29 = vpop.f32.mrb[31].mxu1  ;;  %v1556_v23 = vld [vmem:[%s2570_s2 + $0x20] sm:$0xff]   ;;  %v1460_v16 = vld [vmem:[%s2569_s0 + $0x128] sm:$0xff] }
 0x7c8   :  { %1632 = vtanh.f32 %v1046_v15  ;;  %v1559_v15 = vld [vmem:[%s2570_s2 + $0x38] sm:$0xff]   ;;  %v1459_v26 = vld [vmem:[%s2569_s0 + $0x120] sm:$0xff]  ;;  %v1461_v28 = vld [vmem:[%s2569_s0 + $0x130] sm:$0xff] }
 0x7c9   :  { %1634 = vtanh.f32 %v1047_v27 }
 0x7ca   :  { %1636 = vtanh.f32 %v1048_v31 }
 0x7d1   :  { %v1631_v32 = vpop.eup %1630 }
 0x7d2   :  { %v1053_v38 = vmul.f32 0.5, %v1631_v32  ;;  %v1633_v2 = vpop.eup %1632 }
 0x7d3   :  { %v1055_v5 = vmul.f32 0.5, %v1633_v2  ;;  %v1635_v6 = vpop.eup %1634 }
 0x7d4   :  { %v1054_v4 = vadd.f32 0.5, %v1053_v38  ;;  %v1637_v11 = vpop.eup %1636 }
 0x7d5   :  { %v1056_v7 = vadd.f32 0.5, %v1055_v5  ;;  %v1057_v3 = vmul.f32 0.5, %v1637_v11 }
 0x7d6   :  { %v1060_v8 = vmul.f32 %v1635_v6, %v1054_v4 }
 0x7d7   :  { %v1059_v9 = vmul.f32 %v1056_v7, %v2334_v0  ;;  %v1058_v12 = vadd.f32 0.5, %v1057_v3 }
 0x7d9   :  { %v2474_v10 = vadd.f32 %v1060_v8, %v1059_v9  ;;  %v1462_v8 = vld [vmem:[%s2569_s0 + $0x138] sm:$0xff] }
 0x7db   :  { %1638 = vtanh.f32 %v2474_v10 }
 0x7e5   :  { %v1639_v13 = vpop.eup %1638 }
 0x7e6   :  { %v1063_v14 = vmul.f32 %v1639_v13, %v1058_v12 }
 0x7e8   :  { %v1069_v33 = vpack.c.bf16 %v1063_v14, %v1063_v14 }
 0x7ea   :  { %1103 = vmatmul.mubr.bf16.vlgmr.msra.gmra.mrb[32].mxu0 %v1069_v33  ;;  %1144 = vmatmul.mubr.bf16.vlgmr.msra.gmra.mrb[32].mxu1 %v1069_v33 }
 0x7eb   :  { %1178 = vmatpush1.bf16.msra.mxu0 %v2220_v56  ;;  %1219 = vmatpush1.bf16.msra.mxu1 %v2226_v57  ;;  %v1456_v56 = vld [vmem:[%s2569_s0 + $0x108] sm:$0xff] }
 0x7ec   :  { %1179 = vmatprep.subr.bf16.mxu0 %v2232_v59  ;;  %1220 = vmatprep.subr.bf16.mxu1 %v2238_v61  ;;  %v1457_v59 = vld [vmem:[%s2569_s0 + $0x110] sm:$0xff] }
 0x7ed   :  { %1209 = vmatprep.mubr.bf16.mxu0 %v1692_v1  ;;  %1250 = vmatprep.mubr.bf16.mxu1 %v1692_v1  ;;  %v1455_v1 = vld [vmem:[%s2569_s0 + $0x100] sm:$0xff] }
 0x7ef   :  { %1180 = vmatpush1.bf16.msra.mxu0 %v2246_v63  ;;  %1221 = vmatpush1.bf16.msra.mxu1 %v2252_v34 }
 0x7f0   :  { %1181 = vmatprep.subr.bf16.mxu0 %v2258_v35  ;;  %1222 = vmatprep.subr.bf16.mxu1 %v2264_v58 }
 0x7f3   :  { %1182 = vmatpush1.bf16.msra.mxu0 %v2270_v36  ;;  %1223 = vmatpush1.bf16.msra.mxu1 %v2276_v60 }
 0x7f4   :  { %1183 = vmatprep.subr.bf16.mxu0 %v2282_v37  ;;  %1224 = vmatprep.subr.bf16.mxu1 %v2288_v62 }
 0x7f7   :  { %1184 = vmatpush1.bf16.msra.mxu0 %v2354_v39  ;;  %1225 = vmatpush1.bf16.msra.mxu1 %v2360_v40  ;;  %v1458_v39 = vld [vmem:[%s2569_s0 + $0x118] sm:$0xff] }
 0x7f8   :  { %1185 = vmatprep.subr.bf16.mxu0 %v2366_v41  ;;  %1226 = vmatprep.subr.bf16.mxu1 %v2372_v42 }
 0x7fb   :  { %1186 = vmatpush1.bf16.msra.mxu0 %v2378_v43  ;;  %1227 = vmatpush1.bf16.msra.mxu1 %v2384_v44 }
 0x7fc   :  { %1187 = vmatprep.subr.bf16.mxu0 %v2390_v45  ;;  %1228 = vmatprep.subr.bf16.mxu1 %v2396_v46 }
 0x7ff   :  { %1188 = vmatpush1.bf16.msra.mxu0 %v2402_v47  ;;  %1229 = vmatpush1.bf16.msra.mxu1 %v2408_v48 }
 0x800   :  { %1189 = vmatprep.subr.bf16.mxu0 %v2414_v49  ;;  %1230 = vmatprep.subr.bf16.mxu1 %v2420_v50 }
 0x803   :  { %1190 = vmatpush1.bf16.msra.mxu0 %v2426_v51  ;;  %1231 = vmatpush1.bf16.msra.mxu1 %v2432_v52 }
 0x804   :  { %1191 = vmatprep.subr.bf16.mxu0 %v2438_v53  ;;  %1232 = vmatprep.subr.bf16.mxu1 %v2444_v54 }
 0x807   :  { %1192 = vmatpush1.bf16.msra.mxu0 %v2450_v55  ;;  %1233 = vmatpush1.bf16.msra.mxu1 %v2456_v17 }
 0x808   :  { %1481 = vmatprep.subr.bf16.mxu0 %v1693_v19 }
 0x8bd   :  { %v1104_v57 = vpop.f32.mrb[32].mxu0  ;;  %v1145_v61 = vpop.f32.mrb[32].mxu1 }
 0x8be   :  { %v1152_v63 = vadd.f32 %v1455_v1, %v1104_v57  ;;  %v1106_v34 = vpop.f32.mrb[33].mxu0  ;;  %v1147_v35 = vpop.f32.mrb[33].mxu1  ;;  %v1154_v37 = vadd.f32 %v1457_v59, %v1145_v61 }
 0x8bf   :  { %v1153_v58 = vadd.f32 %v1456_v56, %v1106_v34  ;;  %v1108_v36 = vpop.f32.mrb[34].mxu0  ;;  %v1149_v60 = vpop.f32.mrb[34].mxu1  ;;  %v1155_v40 = vadd.f32 %v1458_v39, %v1147_v35 }
 0x8c0   :  { %1640 = vtanh.f32 %v1152_v63  ;;  %v1109_v62 = vpop.f32.mrb[35].mxu0  ;;  %v1150_v0 = vpop.f32.mrb[35].mxu1  ;;  %v1463_v36 = vld [vmem:[%s2571_s3] ss:$0 sm:$0xff] }
 0x8c1   :  { %1642 = vtanh.f32 %v1153_v58 }
 0x8c2   :  { %1644 = vtanh.f32 %v1154_v37 }
 0x8c3   :  { %1646 = vtanh.f32 %v1155_v40 }
 0x8ca   :  { %v1641_v41 = vpop.eup %1640 }
 0x8cb   :  { %v1160_v42 = vmul.f32 0.5, %v1641_v41  ;;  %v1643_v43 = vpop.eup %1642 }
 0x8cc   :  { %v1162_v45 = vmul.f32 0.5, %v1643_v43  ;;  %v1645_v46 = vpop.eup %1644 }
 0x8cd   :  { %v1161_v44 = vadd.f32 0.5, %v1160_v42  ;;  %v1647_v51 = vpop.eup %1646 }
 0x8ce   :  { %v1163_v47 = vadd.f32 0.5, %v1162_v45  ;;  %v1164_v52 = vmul.f32 0.5, %v1647_v51 }
 0x8cf   :  { %v1167_v48 = vmul.f32 %v1645_v46, %v1161_v44 }
 0x8d0   :  { %v1166_v49 = vmul.f32 %v1163_v47, %v2474_v10  ;;  %v1165_v53 = vadd.f32 0.5, %v1164_v52 }
 0x8d2   :  { %v2522_v50 = vadd.f32 %v1167_v48, %v1166_v49 }
 0x8d4   :  { %1648 = vtanh.f32 %v2522_v50 }
 0x8de   :  { %v1649_v54 = vpop.eup %1648 }
 0x8df   :  { %v1170_v55 = vmul.f32 %v1649_v54, %v1165_v53 }
 0x8e1   :  { %v1176_v17 = vpack.c.bf16 %v1170_v55, %v1170_v55 }
 0x8e3   :  { %1210 = vmatmul.mubr.bf16.vlgmr.msra.gmra.mrb[36].mxu0 %v1176_v17  ;;  %1251 = vmatmul.mubr.bf16.vlgmr.msra.gmra.mrb[36].mxu1 %v1176_v17 }
 0x8e4   :  { %1482 = vmatpush3.bf16.msra.mxu0 %v1552_v18  ;;  %1497 = vmatprep.mubr.msk.bf16.mxu0 %vm1694_vm0, %v1693_v19 }
 0x8e5   :  { %1483 = vmatprep.subr.bf16.mxu0 %v1693_v19 }
 0x8e8   :  { %1484 = vmatpush3.bf16.msra.mxu0 %v1553_v20 }
 0x8e9   :  { %1485 = vmatprep.subr.bf16.mxu0 %v1693_v19 }
 0x8ec   :  { %1486 = vmatpush3.bf16.msra.mxu0 %v1554_v21 }
 0x8ed   :  { %1487 = vmatprep.subr.bf16.mxu0 %v1693_v19 }
 0x8f0   :  { %1488 = vmatpush3.bf16.msra.mxu0 %v1555_v22 }
 0x8f1   :  { %1489 = vmatprep.subr.bf16.mxu0 %v1693_v19 }
 0x8f4   :  { %1490 = vmatpush3.bf16.msra.mxu0 %v1556_v23 }
 0x8f5   :  { %1491 = vmatprep.subr.bf16.mxu0 %v1693_v19 }
 0x8f8   :  { %1492 = vmatpush3.bf16.msra.mxu0 %v1557_v24 }
 0x8f9   :  { %1493 = vmatprep.subr.bf16.mxu0 %v1693_v19 }
 0x8fc   :  { %1494 = vmatpush3.bf16.msra.mxu0 %v1558_v25 }
 0x8fd   :  { %1495 = vmatprep.subr.bf16.mxu0 %v1693_v19 }
 0x900   :  { %1496 = vmatpush3.bf16.msra.mxu0 %v1559_v15 }
 0x9b6   :  { %v1211_v27 = vpop.f32.mrb[36].mxu0  ;;  %v1252_v29 = vpop.f32.mrb[36].mxu1 }
 0x9b7   :  { %v1259_v30 = vadd.f32 %v1459_v26, %v1211_v27  ;;  %v1213_v31 = vpop.f32.mrb[37].mxu0  ;;  %v1254_v32 = vpop.f32.mrb[37].mxu1  ;;  %v1261_v5 = vadd.f32 %v1461_v28, %v1252_v29 }
 0x9b8   :  { %v1260_v38 = vadd.f32 %v1460_v16, %v1213_v31  ;;  %v1215_v2 = vpop.f32.mrb[38].mxu0  ;;  %v1256_v4 = vpop.f32.mrb[38].mxu1  ;;  %v1262_v9 = vadd.f32 %v1462_v8, %v1254_v32 }
 0x9b9   :  { %1650 = vtanh.f32 %v1259_v30  ;;  %v1216_v6 = vpop.f32.mrb[39].mxu0  ;;  %v1257_v7 = vpop.f32.mrb[39].mxu1 }
 0x9ba   :  { %1652 = vtanh.f32 %v1260_v38 }
 0x9bb   :  { %1654 = vtanh.f32 %v1261_v5 }
 0x9bc   :  { %1656 = vtanh.f32 %v1262_v9 }
 0x9c3   :  { %v1651_v10 = vpop.eup %1650 }
 0x9c4   :  { %v1267_v11 = vmul.f32 0.5, %v1651_v10  ;;  %v1653_v3 = vpop.eup %1652 }
 0x9c5   :  { %v1269_v13 = vmul.f32 0.5, %v1653_v3  ;;  %v1655_v14 = vpop.eup %1654 }
 0x9c6   :  { %v1268_v12 = vadd.f32 0.5, %v1267_v11  ;;  %v1657_v59 = vpop.eup %1656 }
 0x9c7   :  { %v1270_v33 = vadd.f32 0.5, %v1269_v13  ;;  %v1271_v61 = vmul.f32 0.5, %v1657_v59 }
 0x9c8   :  { %v1274_v1 = vmul.f32 %v1655_v14, %v1268_v12 }
 0x9c9   :  { %v1273_v56 = vmul.f32 %v1270_v33, %v2522_v50  ;;  %v1272_v63 = vadd.f32 0.5, %v1271_v61 }
 0x9cb   :  { %v1275_v57 = vadd.f32 %v1274_v1, %v1273_v56 }
 0x9cd   :  { %1658 = vtanh.f32 %v1275_v57 }
 0x9d7   :  { %v1659_v34 = vpop.eup %1658 }
 0x9d8   :  { %v1277_v35 = vmul.f32 %v1659_v34, %v1272_v63 }
 0x9da   :  { %v1278_v58 = vpack.c.bf16 %v1277_v35, %v1277_v35 }
 0x9dc   :  { %1498 = vmatmul.mubr.bf16.vlgmr.msra.gmra.mrb[40].mxu0 %v1278_v58 }
 0xaaf   :  { %v1384_v60 = vpop.f32.mrb[40].mxu0 }
 0xab0   :  { %v1385_v37 = vadd.f32 %v1463_v36, %v1384_v60  ;;  %v1499_v62 = vpop.f32.mrb[41].mxu0 }
 0xab1   :  { %v1387_v0 = vpop.f32.mrb[42].mxu0 }
 0xab2   :  { %1390 = vst [vmem:[%s2572_s4] sm:$0xff] %v1385_v37  ;;  %v1500_v39 = vpop.f32.mrb[43].mxu0 }

</bundles_post_ra>
